<compile_context>
chip_gen: v7x
topology: tpu7x:2x2x1
jax: 0.10.0
libtpu: 0.0.40
codegen_flags: <defaults>
</compile_context>

<pallas_src>
import jax
import jax.numpy as jnp
from jax.experimental import pallas as pl
from jax.experimental.pallas import tpu as pltpu


_TAPS = ((0, 0), (0, 1), (1, 0), (1, 1))   # 2x2 kernel tap offsets


# ---------------------------------------------------------------------------
# Fused kernel: conv1+tanh -> conv2+tanh -> conv3+tanh, single launch
# ---------------------------------------------------------------------------
def _model_tanh_kernel(x_ref, w1_ref, b1_ref, w2_ref, b2_ref, w3_ref, b3_ref,
                       o_ref, pbuf):
    n, cin, h, w = x_ref.shape
    hp, wp = h + 2, w + 2                    # conv1 padding=1
    f1h, f1w = hp - 1, wp - 1                # uncompacted conv1 extent (17x17)
    f2h, f2w = f1h - 2, f1w - 2              # uncompacted conv2 extent (15x15)
    f3h, f3w = f2h - 4, f2w - 4              # uncompacted conv3 extent (11x11)
    oh, ow = o_ref.shape[2], o_ref.shape[3]  # final 3x3

    # ---- read every weight/bias scalar from SMEM exactly once -------------
    w1 = [w1_ref[k] for k in range(2 * cin * 4)]
    w2 = [w2_ref[k] for k in range(2 * 2 * 4)]
    w3 = [w3_ref[k] for k in range(1 * 2 * 4)]
    b1 = [b1_ref[k] for k in range(2)]
    b2 = [b2_ref[k] for k in range(2)]
    b3 = b3_ref[0]

    # ---- conv1 padding=1 built in-kernel via zero-filled VMEM scratch ------
    pbuf[...] = jnp.zeros(pbuf.shape, jnp.float32)
    pbuf[:, :, 1:h + 1, 1:w + 1] = x_ref[...]

    # ---- layer 1: taps at offsets {0,1}; batch vectorised; taps hoisted ----
    taps1 = [[pbuf[:, ci, i:i + f1h, j:j + f1w] for (i, j) in _TAPS]
             for ci in range(cin)]
    t1 = []
    for co in range(2):
        acc = None
        for ci in range(cin):
            for t, (i, j) in enumerate(_TAPS):
                wv = w1[((co * cin + ci) * 2 + i) * 2 + j]
                term = wv * taps1[ci][t]
                acc = term if acc is None else acc + term
        t1.append(jnp.tanh(acc + b1[co]))                    # (n, f1h, f1w)

    # ---- layer 2: stride-2 becomes taps at offsets {0,2} (no compaction) ---
    taps2 = [[t1[ci][:, 2 * i:2 * i + f2h, 2 * j:2 * j + f2w] for (i, j) in _TAPS]
             for ci in range(2)]
    t2 = []
    for co in range(2):
        acc = None
        for ci in range(2):
            for t, (i, j) in enumerate(_TAPS):
                wv = w2[((co * 2 + ci) * 2 + i) * 2 + j]
                term = wv * taps2[ci][t]
                acc = term if acc is None else acc + term
        t2.append(jnp.tanh(acc + b2[co]))                    # (n, f2h, f2w)

    # ---- layer 3: previous stride-2s accumulate -> taps at offsets {0,4} ---
    taps3 = [[t2[ci][:, 4 * i:4 * i + f3h, 4 * j:4 * j + f3w] for (i, j) in _TAPS]
             for ci in range(2)]
    acc = None
    for ci in range(2):
        for t, (i, j) in enumerate(_TAPS):
            wv = w3[(ci * 2 + i) * 2 + j]
            term = wv * taps3[ci][t]
            acc = term if acc is None else acc + term
    t3 = jnp.tanh(acc + b3)                                  # (n, f3h, f3w)

    # ---- gather the valid stride-4 grid (rows/cols 0,4,8) and store once ---
    cols = jnp.concatenate([t3[:, :, 4 * ox:4 * ox + 1] for ox in range(ow)],
                           axis=2)                           # (n, f3h, ow)
    out = jnp.concatenate([cols[:, 4 * oy:4 * oy + 1, :] for oy in range(oh)],
                          axis=1)                            # (n, oh, ow)
    o_ref[:, 0, :, :] = out


# ---------------------------------------------------------------------------
# One-time parameter packing (outside the forward path)
# ---------------------------------------------------------------------------
def pack_params(params):
    """Flatten each (cout, cin, 2, 2) weight row-major for SMEM scalar reads."""
    return {
        "w1": params["w1"].reshape(-1), "b1": params["b1"],
        "w2": params["w2"].reshape(-1), "b2": params["b2"],
        "w3": params["w3"].reshape(-1), "b3": params["b3"],
    }


# ---------------------------------------------------------------------------
# Forward wrapper: single pallas_call, raw NCHW in / NCHW out, no glue ops
# ---------------------------------------------------------------------------
@jax.jit
def model_tanh_forward(x_nchw, packed):
    n, cin, h, w = x_nchw.shape
    hp, wp = h + 2, w + 2
    oh1, ow1 = (hp - 2) // 2 + 1, (wp - 2) // 2 + 1
    oh2, ow2 = (oh1 - 2) // 2 + 1, (ow1 - 2) // 2 + 1
    oh3, ow3 = oh2 - 1, ow2 - 1

    vmem = pl.BlockSpec(memory_space=pltpu.MemorySpace.VMEM)
    smem = pl.BlockSpec(memory_space=pltpu.MemorySpace.SMEM)

    return pl.pallas_call(
        _model_tanh_kernel,
        out_shape=jax.ShapeDtypeStruct((n, 1, oh3, ow3), jnp.float32),
        in_specs=[vmem, smem, smem, smem, smem, smem, smem],
        out_specs=vmem,
        scratch_shapes=[pltpu.VMEM((n, cin, hp, wp), jnp.float32)],
    )(x_nchw, packed["w1"], packed["b1"], packed["w2"], packed["b2"],
      packed["w3"], packed["b3"])


# ---------------------------------------------------------------------------
# Deterministic parameter init (PyTorch Conv2d default: U(-1/sqrt(fan_in), +))
# ---------------------------------------------------------------------------
def init_params(key):
    def conv_init(k, cout, cin, kh, kw):
        kw_, kb_ = jax.random.split(k)
        fan_in = cin * kh * kw
        bound = 1.0 / jnp.sqrt(fan_in)
        wgt = jax.random.uniform(kw_, (cout, cin, kh, kw), jnp.float32, -bound, bound)
        bias = jax.random.uniform(kb_, (cout,), jnp.float32, -bound, bound)
        return wgt, bias

    k1, k2, k3 = jax.random.split(key, 3)
    w1, b1 = conv_init(k1, 2, 3, 2, 2)   # Conv2d(3, 2, 2, stride=2, padding=1)
    w2, b2 = conv_init(k2, 2, 2, 2, 2)   # Conv2d(2, 2, 2, stride=2)
    w3, b3 = conv_init(k3, 1, 2, 2, 2)   # Conv2d(2, 1, 2)
    return dict(w1=w1, b1=b1, w2=w2, b2=b2, w3=w3, b3=b3)


# ---------------------------------------------------------------------------
# Pure-JAX reference (correctness check)
# ---------------------------------------------------------------------------
def _ref_forward(x_nchw, params):
    def conv(x, w, b, stride, padding):
        y = jax.lax.conv_general_dilated(
            x, w, window_strides=(stride, stride),
            padding=((padding, padding), (padding, padding)),
            dimension_numbers=("NCHW", "OIHW", "NCHW"))
        return jnp.tanh(y + b.reshape(1, -1, 1, 1))

    x = conv(x_nchw, params["w1"], params["b1"], 2, 1)
    x = conv(x, params["w2"], params["b2"], 2, 0)
    x = conv(x, params["w3"], params["b3"], 1, 0)
    return x


if __name__ == "__main__":
    key = jax.random.PRNGKey(0)
    kx, kp = jax.random.split(key)

    # Small shapes consistent with the module: batch=2, 3 input channels, 16x16.
    x = jax.random.normal(kx, (2, 3, 16, 16), dtype=jnp.float32)
    params = init_params(kp)
    packed = pack_params(params)          # one-time packing, outside the forward path

    out = jax.block_until_ready(model_tanh_forward(x, packed))
    ref = jax.block_until_ready(_ref_forward(x, params))

    assert out.shape == ref.shape == (2, 1, 3, 3), out.shape
    assert jnp.allclose(out, ref, atol=1e-4, rtol=1e-4), float(jnp.max(jnp.abs(out - ref)))

    print("KERNEL_OK")
</pallas_src>

<mosaic_0001>
module attributes {stable_mosaic.version = 11 : i64} {
  func.func @_model_tanh_kernel(%arg0: memref<2x3x16x16xf32, #tpu.memory_space<vmem>>, %arg1: memref<24xf32, #tpu.memory_space<smem>>, %arg2: memref<2xf32, #tpu.memory_space<smem>>, %arg3: memref<16xf32, #tpu.memory_space<smem>>, %arg4: memref<2xf32, #tpu.memory_space<smem>>, %arg5: memref<8xf32, #tpu.memory_space<smem>>, %arg6: memref<1xf32, #tpu.memory_space<smem>>, %arg7: memref<2x1x3x3xf32, #tpu.memory_space<vmem>>, %arg8: memref<2x3x18x18xf32, #tpu.memory_space<vmem>>) attributes {dimension_semantics = [], scalar_prefetch = 0 : i64, scratch_operands = 1 : i64, tpu.core_type = #tpu.core_type<tc>} {
    %c0 = arith.constant 0 : index
    %0 = memref.load %arg1[%c0] : memref<24xf32, #tpu.memory_space<smem>>
    %c1 = arith.constant 1 : index
    %1 = memref.load %arg1[%c1] : memref<24xf32, #tpu.memory_space<smem>>
    %c2 = arith.constant 2 : index
    %2 = memref.load %arg1[%c2] : memref<24xf32, #tpu.memory_space<smem>>
    %c3 = arith.constant 3 : index
    %3 = memref.load %arg1[%c3] : memref<24xf32, #tpu.memory_space<smem>>
    %c4 = arith.constant 4 : index
    %4 = memref.load %arg1[%c4] : memref<24xf32, #tpu.memory_space<smem>>
    %c5 = arith.constant 5 : index
    %5 = memref.load %arg1[%c5] : memref<24xf32, #tpu.memory_space<smem>>
    %c6 = arith.constant 6 : index
    %6 = memref.load %arg1[%c6] : memref<24xf32, #tpu.memory_space<smem>>
    %c7 = arith.constant 7 : index
    %7 = memref.load %arg1[%c7] : memref<24xf32, #tpu.memory_space<smem>>
    %c8 = arith.constant 8 : index
    %8 = memref.load %arg1[%c8] : memref<24xf32, #tpu.memory_space<smem>>
    %c9 = arith.constant 9 : index
    %9 = memref.load %arg1[%c9] : memref<24xf32, #tpu.memory_space<smem>>
    %c10 = arith.constant 10 : index
    %10 = memref.load %arg1[%c10] : memref<24xf32, #tpu.memory_space<smem>>
    %c11 = arith.constant 11 : index
    %11 = memref.load %arg1[%c11] : memref<24xf32, #tpu.memory_space<smem>>
    %c12 = arith.constant 12 : index
    %12 = memref.load %arg1[%c12] : memref<24xf32, #tpu.memory_space<smem>>
    %c13 = arith.constant 13 : index
    %13 = memref.load %arg1[%c13] : memref<24xf32, #tpu.memory_space<smem>>
    %c14 = arith.constant 14 : index
    %14 = memref.load %arg1[%c14] : memref<24xf32, #tpu.memory_space<smem>>
    %c15 = arith.constant 15 : index
    %15 = memref.load %arg1[%c15] : memref<24xf32, #tpu.memory_space<smem>>
    %c16 = arith.constant 16 : index
    %16 = memref.load %arg1[%c16] : memref<24xf32, #tpu.memory_space<smem>>
    %c17 = arith.constant 17 : index
    %17 = memref.load %arg1[%c17] : memref<24xf32, #tpu.memory_space<smem>>
    %c18 = arith.constant 18 : index
    %18 = memref.load %arg1[%c18] : memref<24xf32, #tpu.memory_space<smem>>
    %c19 = arith.constant 19 : index
    %19 = memref.load %arg1[%c19] : memref<24xf32, #tpu.memory_space<smem>>
    %c20 = arith.constant 20 : index
    %20 = memref.load %arg1[%c20] : memref<24xf32, #tpu.memory_space<smem>>
    %c21 = arith.constant 21 : index
    %21 = memref.load %arg1[%c21] : memref<24xf32, #tpu.memory_space<smem>>
    %c22 = arith.constant 22 : index
    %22 = memref.load %arg1[%c22] : memref<24xf32, #tpu.memory_space<smem>>
    %c23 = arith.constant 23 : index
    %23 = memref.load %arg1[%c23] : memref<24xf32, #tpu.memory_space<smem>>
    %c0_0 = arith.constant 0 : index
    %24 = memref.load %arg3[%c0_0] : memref<16xf32, #tpu.memory_space<smem>>
    %c1_1 = arith.constant 1 : index
    %25 = memref.load %arg3[%c1_1] : memref<16xf32, #tpu.memory_space<smem>>
    %c2_2 = arith.constant 2 : index
    %26 = memref.load %arg3[%c2_2] : memref<16xf32, #tpu.memory_space<smem>>
    %c3_3 = arith.constant 3 : index
    %27 = memref.load %arg3[%c3_3] : memref<16xf32, #tpu.memory_space<smem>>
    %c4_4 = arith.constant 4 : index
    %28 = memref.load %arg3[%c4_4] : memref<16xf32, #tpu.memory_space<smem>>
    %c5_5 = arith.constant 5 : index
    %29 = memref.load %arg3[%c5_5] : memref<16xf32, #tpu.memory_space<smem>>
    %c6_6 = arith.constant 6 : index
    %30 = memref.load %arg3[%c6_6] : memref<16xf32, #tpu.memory_space<smem>>
    %c7_7 = arith.constant 7 : index
    %31 = memref.load %arg3[%c7_7] : memref<16xf32, #tpu.memory_space<smem>>
    %c8_8 = arith.constant 8 : index
    %32 = memref.load %arg3[%c8_8] : memref<16xf32, #tpu.memory_space<smem>>
    %c9_9 = arith.constant 9 : index
    %33 = memref.load %arg3[%c9_9] : memref<16xf32, #tpu.memory_space<smem>>
    %c10_10 = arith.constant 10 : index
    %34 = memref.load %arg3[%c10_10] : memref<16xf32, #tpu.memory_space<smem>>
    %c11_11 = arith.constant 11 : index
    %35 = memref.load %arg3[%c11_11] : memref<16xf32, #tpu.memory_space<smem>>
    %c12_12 = arith.constant 12 : index
    %36 = memref.load %arg3[%c12_12] : memref<16xf32, #tpu.memory_space<smem>>
    %c13_13 = arith.constant 13 : index
    %37 = memref.load %arg3[%c13_13] : memref<16xf32, #tpu.memory_space<smem>>
    %c14_14 = arith.constant 14 : index
    %38 = memref.load %arg3[%c14_14] : memref<16xf32, #tpu.memory_space<smem>>
    %c15_15 = arith.constant 15 : index
    %39 = memref.load %arg3[%c15_15] : memref<16xf32, #tpu.memory_space<smem>>
    %c0_16 = arith.constant 0 : index
    %40 = memref.load %arg5[%c0_16] : memref<8xf32, #tpu.memory_space<smem>>
    %c1_17 = arith.constant 1 : index
    %41 = memref.load %arg5[%c1_17] : memref<8xf32, #tpu.memory_space<smem>>
    %c2_18 = arith.constant 2 : index
    %42 = memref.load %arg5[%c2_18] : memref<8xf32, #tpu.memory_space<smem>>
    %c3_19 = arith.constant 3 : index
    %43 = memref.load %arg5[%c3_19] : memref<8xf32, #tpu.memory_space<smem>>
    %c4_20 = arith.constant 4 : index
    %44 = memref.load %arg5[%c4_20] : memref<8xf32, #tpu.memory_space<smem>>
    %c5_21 = arith.constant 5 : index
    %45 = memref.load %arg5[%c5_21] : memref<8xf32, #tpu.memory_space<smem>>
    %c6_22 = arith.constant 6 : index
    %46 = memref.load %arg5[%c6_22] : memref<8xf32, #tpu.memory_space<smem>>
    %c7_23 = arith.constant 7 : index
    %47 = memref.load %arg5[%c7_23] : memref<8xf32, #tpu.memory_space<smem>>
    %c0_24 = arith.constant 0 : index
    %48 = memref.load %arg2[%c0_24] : memref<2xf32, #tpu.memory_space<smem>>
    %c1_25 = arith.constant 1 : index
    %49 = memref.load %arg2[%c1_25] : memref<2xf32, #tpu.memory_space<smem>>
    %c0_26 = arith.constant 0 : index
    %50 = memref.load %arg4[%c0_26] : memref<2xf32, #tpu.memory_space<smem>>
    %c1_27 = arith.constant 1 : index
    %51 = memref.load %arg4[%c1_27] : memref<2xf32, #tpu.memory_space<smem>>
    %c0_28 = arith.constant 0 : index
    %52 = memref.load %arg6[%c0_28] : memref<1xf32, #tpu.memory_space<smem>>
    %cst = arith.constant 0.000000e+00 : f32
    %53 = vector.broadcast %cst : f32 to vector<2x3x18x18xf32>
    %c0_29 = arith.constant 0 : index
    %c0_30 = arith.constant 0 : index
    %c0_31 = arith.constant 0 : index
    %c0_32 = arith.constant 0 : index
    %54 = vector.load %arg8[%c0_29, %c0_30, %c0_31, %c0_32] : memref<2x3x18x18xf32, #tpu.memory_space<vmem>>, vector<2x3x18x18xf32>
    tpu.vector_store %arg8[%c0_29, %c0_30, %c0_31, %c0_32], %53 {strides = array<i32>} : memref<2x3x18x18xf32, #tpu.memory_space<vmem>>, vector<2x3x18x18xf32>,
    %c0_33 = arith.constant 0 : index
    %c0_34 = arith.constant 0 : index
    %c0_35 = arith.constant 0 : index
    %c0_36 = arith.constant 0 : index
    %55 = vector.load %arg0[%c0_33, %c0_34, %c0_35, %c0_36] : memref<2x3x16x16xf32, #tpu.memory_space<vmem>>, vector<2x3x16x16xf32>
    %c0_37 = arith.constant 0 : index
    %c0_38 = arith.constant 0 : index
    %c1_39 = arith.constant 1 : index
    %c1_40 = arith.constant 1 : index
    %56 = vector.load %arg8[%c0_37, %c0_38, %c1_39, %c1_40] : memref<2x3x18x18xf32, #tpu.memory_space<vmem>>, vector<2x3x16x16xf32>
    tpu.vector_store %arg8[%c0_37, %c0_38, %c1_39, %c1_40], %55 {strides = array<i32>} : memref<2x3x18x18xf32, #tpu.memory_space<vmem>>, vector<2x3x16x16xf32>,
    %c0_41 = arith.constant 0 : index
    %c0_42 = arith.constant 0 : index
    %c0_43 = arith.constant 0 : index
    %c0_44 = arith.constant 0 : index
    %57 = vector.load %arg8[%c0_41, %c0_42, %c0_43, %c0_44] : memref<2x3x18x18xf32, #tpu.memory_space<vmem>>, vector<2x1x17x17xf32>
    %58 = vector.shape_cast %57 : vector<2x1x17x17xf32> to vector<2x17x17xf32>
    %c0_45 = arith.constant 0 : index
    %c0_46 = arith.constant 0 : index
    %c0_47 = arith.constant 0 : index
    %c1_48 = arith.constant 1 : index
    %59 = vector.load %arg8[%c0_45, %c0_46, %c0_47, %c1_48] : memref<2x3x18x18xf32, #tpu.memory_space<vmem>>, vector<2x1x17x17xf32>
    %60 = vector.shape_cast %59 : vector<2x1x17x17xf32> to vector<2x17x17xf32>
    %c0_49 = arith.constant 0 : index
    %c0_50 = arith.constant 0 : index
    %c1_51 = arith.constant 1 : index
    %c0_52 = arith.constant 0 : index
    %61 = vector.load %arg8[%c0_49, %c0_50, %c1_51, %c0_52] : memref<2x3x18x18xf32, #tpu.memory_space<vmem>>, vector<2x1x17x17xf32>
    %62 = vector.shape_cast %61 : vector<2x1x17x17xf32> to vector<2x17x17xf32>
    %c0_53 = arith.constant 0 : index
    %c0_54 = arith.constant 0 : index
    %c1_55 = arith.constant 1 : index
    %c1_56 = arith.constant 1 : index
    %63 = vector.load %arg8[%c0_53, %c0_54, %c1_55, %c1_56] : memref<2x3x18x18xf32, #tpu.memory_space<vmem>>, vector<2x1x17x17xf32>
    %64 = vector.shape_cast %63 : vector<2x1x17x17xf32> to vector<2x17x17xf32>
    %c0_57 = arith.constant 0 : index
    %c1_58 = arith.constant 1 : index
    %c0_59 = arith.constant 0 : index
    %c0_60 = arith.constant 0 : index
    %65 = vector.load %arg8[%c0_57, %c1_58, %c0_59, %c0_60] : memref<2x3x18x18xf32, #tpu.memory_space<vmem>>, vector<2x1x17x17xf32>
    %66 = vector.shape_cast %65 : vector<2x1x17x17xf32> to vector<2x17x17xf32>
    %c0_61 = arith.constant 0 : index
    %c1_62 = arith.constant 1 : index
    %c0_63 = arith.constant 0 : index
    %c1_64 = arith.constant 1 : index
    %67 = vector.load %arg8[%c0_61, %c1_62, %c0_63, %c1_64] : memref<2x3x18x18xf32, #tpu.memory_space<vmem>>, vector<2x1x17x17xf32>
    %68 = vector.shape_cast %67 : vector<2x1x17x17xf32> to vector<2x17x17xf32>
    %c0_65 = arith.constant 0 : index
    %c1_66 = arith.constant 1 : index
    %c1_67 = arith.constant 1 : index
    %c0_68 = arith.constant 0 : index
    %69 = vector.load %arg8[%c0_65, %c1_66, %c1_67, %c0_68] : memref<2x3x18x18xf32, #tpu.memory_space<vmem>>, vector<2x1x17x17xf32>
    %70 = vector.shape_cast %69 : vector<2x1x17x17xf32> to vector<2x17x17xf32>
    %c0_69 = arith.constant 0 : index
    %c1_70 = arith.constant 1 : index
    %c1_71 = arith.constant 1 : index
    %c1_72 = arith.constant 1 : index
    %71 = vector.load %arg8[%c0_69, %c1_70, %c1_71, %c1_72] : memref<2x3x18x18xf32, #tpu.memory_space<vmem>>, vector<2x1x17x17xf32>
    %72 = vector.shape_cast %71 : vector<2x1x17x17xf32> to vector<2x17x17xf32>
    %c0_73 = arith.constant 0 : index
    %c2_74 = arith.constant 2 : index
    %c0_75 = arith.constant 0 : index
    %c0_76 = arith.constant 0 : index
    %73 = vector.load %arg8[%c0_73, %c2_74, %c0_75, %c0_76] : memref<2x3x18x18xf32, #tpu.memory_space<vmem>>, vector<2x1x17x17xf32>
    %74 = vector.shape_cast %73 : vector<2x1x17x17xf32> to vector<2x17x17xf32>
    %c0_77 = arith.constant 0 : index
    %c2_78 = arith.constant 2 : index
    %c0_79 = arith.constant 0 : index
    %c1_80 = arith.constant 1 : index
    %75 = vector.load %arg8[%c0_77, %c2_78, %c0_79, %c1_80] : memref<2x3x18x18xf32, #tpu.memory_space<vmem>>, vector<2x1x17x17xf32>
    %76 = vector.shape_cast %75 : vector<2x1x17x17xf32> to vector<2x17x17xf32>
    %c0_81 = arith.constant 0 : index
    %c2_82 = arith.constant 2 : index
    %c1_83 = arith.constant 1 : index
    %c0_84 = arith.constant 0 : index
    %77 = vector.load %arg8[%c0_81, %c2_82, %c1_83, %c0_84] : memref<2x3x18x18xf32, #tpu.memory_space<vmem>>, vector<2x1x17x17xf32>
    %78 = vector.shape_cast %77 : vector<2x1x17x17xf32> to vector<2x17x17xf32>
    %c0_85 = arith.constant 0 : index
    %c2_86 = arith.constant 2 : index
    %c1_87 = arith.constant 1 : index
    %c1_88 = arith.constant 1 : index
    %79 = vector.load %arg8[%c0_85, %c2_86, %c1_87, %c1_88] : memref<2x3x18x18xf32, #tpu.memory_space<vmem>>, vector<2x1x17x17xf32>
    %80 = vector.shape_cast %79 : vector<2x1x17x17xf32> to vector<2x17x17xf32>
    %81 = vector.broadcast %0 : f32 to vector<2x17x17xf32>
    %82 = arith.mulf %81, %58 : vector<2x17x17xf32>
    %83 = vector.broadcast %1 : f32 to vector<2x17x17xf32>
    %84 = arith.mulf %83, %60 : vector<2x17x17xf32>
    %85 = arith.addf %82, %84 : vector<2x17x17xf32>
    %86 = vector.broadcast %2 : f32 to vector<2x17x17xf32>
    %87 = arith.mulf %86, %62 : vector<2x17x17xf32>
    %88 = arith.addf %85, %87 : vector<2x17x17xf32>
    %89 = vector.broadcast %3 : f32 to vector<2x17x17xf32>
    %90 = arith.mulf %89, %64 : vector<2x17x17xf32>
    %91 = arith.addf %88, %90 : vector<2x17x17xf32>
    %92 = vector.broadcast %4 : f32 to vector<2x17x17xf32>
    %93 = arith.mulf %92, %66 : vector<2x17x17xf32>
    %94 = arith.addf %91, %93 : vector<2x17x17xf32>
    %95 = vector.broadcast %5 : f32 to vector<2x17x17xf32>
    %96 = arith.mulf %95, %68 : vector<2x17x17xf32>
    %97 = arith.addf %94, %96 : vector<2x17x17xf32>
    %98 = vector.broadcast %6 : f32 to vector<2x17x17xf32>
    %99 = arith.mulf %98, %70 : vector<2x17x17xf32>
    %100 = arith.addf %97, %99 : vector<2x17x17xf32>
    %101 = vector.broadcast %7 : f32 to vector<2x17x17xf32>
    %102 = arith.mulf %101, %72 : vector<2x17x17xf32>
    %103 = arith.addf %100, %102 : vector<2x17x17xf32>
    %104 = vector.broadcast %8 : f32 to vector<2x17x17xf32>
    %105 = arith.mulf %104, %74 : vector<2x17x17xf32>
    %106 = arith.addf %103, %105 : vector<2x17x17xf32>
    %107 = vector.broadcast %9 : f32 to vector<2x17x17xf32>
    %108 = arith.mulf %107, %76 : vector<2x17x17xf32>
    %109 = arith.addf %106, %108 : vector<2x17x17xf32>
    %110 = vector.broadcast %10 : f32 to vector<2x17x17xf32>
    %111 = arith.mulf %110, %78 : vector<2x17x17xf32>
    %112 = arith.addf %109, %111 : vector<2x17x17xf32>
    %113 = vector.broadcast %11 : f32 to vector<2x17x17xf32>
    %114 = arith.mulf %113, %80 : vector<2x17x17xf32>
    %115 = arith.addf %112, %114 : vector<2x17x17xf32>
    %116 = vector.broadcast %48 : f32 to vector<2x17x17xf32>
    %117 = arith.addf %115, %116 : vector<2x17x17xf32>
    %118 = math.tanh %117 : vector<2x17x17xf32>
    %119 = vector.broadcast %12 : f32 to vector<2x17x17xf32>
    %120 = arith.mulf %119, %58 : vector<2x17x17xf32>
    %121 = vector.broadcast %13 : f32 to vector<2x17x17xf32>
    %122 = arith.mulf %121, %60 : vector<2x17x17xf32>
    %123 = arith.addf %120, %122 : vector<2x17x17xf32>
    %124 = vector.broadcast %14 : f32 to vector<2x17x17xf32>
    %125 = arith.mulf %124, %62 : vector<2x17x17xf32>
    %126 = arith.addf %123, %125 : vector<2x17x17xf32>
    %127 = vector.broadcast %15 : f32 to vector<2x17x17xf32>
    %128 = arith.mulf %127, %64 : vector<2x17x17xf32>
    %129 = arith.addf %126, %128 : vector<2x17x17xf32>
    %130 = vector.broadcast %16 : f32 to vector<2x17x17xf32>
    %131 = arith.mulf %130, %66 : vector<2x17x17xf32>
    %132 = arith.addf %129, %131 : vector<2x17x17xf32>
    %133 = vector.broadcast %17 : f32 to vector<2x17x17xf32>
    %134 = arith.mulf %133, %68 : vector<2x17x17xf32>
    %135 = arith.addf %132, %134 : vector<2x17x17xf32>
    %136 = vector.broadcast %18 : f32 to vector<2x17x17xf32>
    %137 = arith.mulf %136, %70 : vector<2x17x17xf32>
    %138 = arith.addf %135, %137 : vector<2x17x17xf32>
    %139 = vector.broadcast %19 : f32 to vector<2x17x17xf32>
    %140 = arith.mulf %139, %72 : vector<2x17x17xf32>
    %141 = arith.addf %138, %140 : vector<2x17x17xf32>
    %142 = vector.broadcast %20 : f32 to vector<2x17x17xf32>
    %143 = arith.mulf %142, %74 : vector<2x17x17xf32>
    %144 = arith.addf %141, %143 : vector<2x17x17xf32>
    %145 = vector.broadcast %21 : f32 to vector<2x17x17xf32>
    %146 = arith.mulf %145, %76 : vector<2x17x17xf32>
    %147 = arith.addf %144, %146 : vector<2x17x17xf32>
    %148 = vector.broadcast %22 : f32 to vector<2x17x17xf32>
    %149 = arith.mulf %148, %78 : vector<2x17x17xf32>
    %150 = arith.addf %147, %149 : vector<2x17x17xf32>
    %151 = vector.broadcast %23 : f32 to vector<2x17x17xf32>
    %152 = arith.mulf %151, %80 : vector<2x17x17xf32>
    %153 = arith.addf %150, %152 : vector<2x17x17xf32>
    %154 = vector.broadcast %49 : f32 to vector<2x17x17xf32>
    %155 = arith.addf %153, %154 : vector<2x17x17xf32>
    %156 = math.tanh %155 : vector<2x17x17xf32>
    %157 = vector.extract_strided_slice %118 {offsets = [0, 0, 0], sizes = [2, 15, 15], strides = [1, 1, 1]} : vector<2x17x17xf32> to vector<2x15x15xf32>
    %158 = vector.extract_strided_slice %118 {offsets = [0, 0, 2], sizes = [2, 15, 15], strides = [1, 1, 1]} : vector<2x17x17xf32> to vector<2x15x15xf32>
    %159 = vector.extract_strided_slice %118 {offsets = [0, 2, 0], sizes = [2, 15, 15], strides = [1, 1, 1]} : vector<2x17x17xf32> to vector<2x15x15xf32>
    %160 = vector.extract_strided_slice %118 {offsets = [0, 2, 2], sizes = [2, 15, 15], strides = [1, 1, 1]} : vector<2x17x17xf32> to vector<2x15x15xf32>
    %161 = vector.extract_strided_slice %156 {offsets = [0, 0, 0], sizes = [2, 15, 15], strides = [1, 1, 1]} : vector<2x17x17xf32> to vector<2x15x15xf32>
    %162 = vector.extract_strided_slice %156 {offsets = [0, 0, 2], sizes = [2, 15, 15], strides = [1, 1, 1]} : vector<2x17x17xf32> to vector<2x15x15xf32>
    %163 = vector.extract_strided_slice %156 {offsets = [0, 2, 0], sizes = [2, 15, 15], strides = [1, 1, 1]} : vector<2x17x17xf32> to vector<2x15x15xf32>
    %164 = vector.extract_strided_slice %156 {offsets = [0, 2, 2], sizes = [2, 15, 15], strides = [1, 1, 1]} : vector<2x17x17xf32> to vector<2x15x15xf32>
    %165 = vector.broadcast %24 : f32 to vector<2x15x15xf32>
    %166 = arith.mulf %165, %157 : vector<2x15x15xf32>
    %167 = vector.broadcast %25 : f32 to vector<2x15x15xf32>
    %168 = arith.mulf %167, %158 : vector<2x15x15xf32>
    %169 = arith.addf %166, %168 : vector<2x15x15xf32>
    %170 = vector.broadcast %26 : f32 to vector<2x15x15xf32>
    %171 = arith.mulf %170, %159 : vector<2x15x15xf32>
    %172 = arith.addf %169, %171 : vector<2x15x15xf32>
    %173 = vector.broadcast %27 : f32 to vector<2x15x15xf32>
    %174 = arith.mulf %173, %160 : vector<2x15x15xf32>
    %175 = arith.addf %172, %174 : vector<2x15x15xf32>
    %176 = vector.broadcast %28 : f32 to vector<2x15x15xf32>
    %177 = arith.mulf %176, %161 : vector<2x15x15xf32>
    %178 = arith.addf %175, %177 : vector<2x15x15xf32>
    %179 = vector.broadcast %29 : f32 to vector<2x15x15xf32>
    %180 = arith.mulf %179, %162 : vector<2x15x15xf32>
    %181 = arith.addf %178, %180 : vector<2x15x15xf32>
    %182 = vector.broadcast %30 : f32 to vector<2x15x15xf32>
    %183 = arith.mulf %182, %163 : vector<2x15x15xf32>
    %184 = arith.addf %181, %183 : vector<2x15x15xf32>
    %185 = vector.broadcast %31 : f32 to vector<2x15x15xf32>
    %186 = arith.mulf %185, %164 : vector<2x15x15xf32>
    %187 = arith.addf %184, %186 : vector<2x15x15xf32>
    %188 = vector.broadcast %50 : f32 to vector<2x15x15xf32>
    %189 = arith.addf %187, %188 : vector<2x15x15xf32>
    %190 = math.tanh %189 : vector<2x15x15xf32>
    %191 = vector.broadcast %32 : f32 to vector<2x15x15xf32>
    %192 = arith.mulf %191, %157 : vector<2x15x15xf32>
    %193 = vector.broadcast %33 : f32 to vector<2x15x15xf32>
    %194 = arith.mulf %193, %158 : vector<2x15x15xf32>
    %195 = arith.addf %192, %194 : vector<2x15x15xf32>
    %196 = vector.broadcast %34 : f32 to vector<2x15x15xf32>
    %197 = arith.mulf %196, %159 : vector<2x15x15xf32>
    %198 = arith.addf %195, %197 : vector<2x15x15xf32>
    %199 = vector.broadcast %35 : f32 to vector<2x15x15xf32>
    %200 = arith.mulf %199, %160 : vector<2x15x15xf32>
    %201 = arith.addf %198, %200 : vector<2x15x15xf32>
    %202 = vector.broadcast %36 : f32 to vector<2x15x15xf32>
    %203 = arith.mulf %202, %161 : vector<2x15x15xf32>
    %204 = arith.addf %201, %203 : vector<2x15x15xf32>
    %205 = vector.broadcast %37 : f32 to vector<2x15x15xf32>
    %206 = arith.mulf %205, %162 : vector<2x15x15xf32>
    %207 = arith.addf %204, %206 : vector<2x15x15xf32>
    %208 = vector.broadcast %38 : f32 to vector<2x15x15xf32>
    %209 = arith.mulf %208, %163 : vector<2x15x15xf32>
    %210 = arith.addf %207, %209 : vector<2x15x15xf32>
    %211 = vector.broadcast %39 : f32 to vector<2x15x15xf32>
    %212 = arith.mulf %211, %164 : vector<2x15x15xf32>
    %213 = arith.addf %210, %212 : vector<2x15x15xf32>
    %214 = vector.broadcast %51 : f32 to vector<2x15x15xf32>
    %215 = arith.addf %213, %214 : vector<2x15x15xf32>
    %216 = math.tanh %215 : vector<2x15x15xf32>
    %217 = vector.extract_strided_slice %190 {offsets = [0, 0, 0], sizes = [2, 11, 11], strides = [1, 1, 1]} : vector<2x15x15xf32> to vector<2x11x11xf32>
    %218 = vector.extract_strided_slice %190 {offsets = [0, 0, 4], sizes = [2, 11, 11], strides = [1, 1, 1]} : vector<2x15x15xf32> to vector<2x11x11xf32>
    %219 = vector.extract_strided_slice %190 {offsets = [0, 4, 0], sizes = [2, 11, 11], strides = [1, 1, 1]} : vector<2x15x15xf32> to vector<2x11x11xf32>
    %220 = vector.extract_strided_slice %190 {offsets = [0, 4, 4], sizes = [2, 11, 11], strides = [1, 1, 1]} : vector<2x15x15xf32> to vector<2x11x11xf32>
    %221 = vector.extract_strided_slice %216 {offsets = [0, 0, 0], sizes = [2, 11, 11], strides = [1, 1, 1]} : vector<2x15x15xf32> to vector<2x11x11xf32>
    %222 = vector.extract_strided_slice %216 {offsets = [0, 0, 4], sizes = [2, 11, 11], strides = [1, 1, 1]} : vector<2x15x15xf32> to vector<2x11x11xf32>
    %223 = vector.extract_strided_slice %216 {offsets = [0, 4, 0], sizes = [2, 11, 11], strides = [1, 1, 1]} : vector<2x15x15xf32> to vector<2x11x11xf32>
    %224 = vector.extract_strided_slice %216 {offsets = [0, 4, 4], sizes = [2, 11, 11], strides = [1, 1, 1]} : vector<2x15x15xf32> to vector<2x11x11xf32>
    %225 = vector.broadcast %40 : f32 to vector<2x11x11xf32>
    %226 = arith.mulf %225, %217 : vector<2x11x11xf32>
    %227 = vector.broadcast %41 : f32 to vector<2x11x11xf32>
    %228 = arith.mulf %227, %218 : vector<2x11x11xf32>
    %229 = arith.addf %226, %228 : vector<2x11x11xf32>
    %230 = vector.broadcast %42 : f32 to vector<2x11x11xf32>
    %231 = arith.mulf %230, %219 : vector<2x11x11xf32>
    %232 = arith.addf %229, %231 : vector<2x11x11xf32>
    %233 = vector.broadcast %43 : f32 to vector<2x11x11xf32>
    %234 = arith.mulf %233, %220 : vector<2x11x11xf32>
    %235 = arith.addf %232, %234 : vector<2x11x11xf32>
    %236 = vector.broadcast %44 : f32 to vector<2x11x11xf32>
    %237 = arith.mulf %236, %221 : vector<2x11x11xf32>
    %238 = arith.addf %235, %237 : vector<2x11x11xf32>
    %239 = vector.broadcast %45 : f32 to vector<2x11x11xf32>
    %240 = arith.mulf %239, %222 : vector<2x11x11xf32>
    %241 = arith.addf %238, %240 : vector<2x11x11xf32>
    %242 = vector.broadcast %46 : f32 to vector<2x11x11xf32>
    %243 = arith.mulf %242, %223 : vector<2x11x11xf32>
    %244 = arith.addf %241, %243 : vector<2x11x11xf32>
    %245 = vector.broadcast %47 : f32 to vector<2x11x11xf32>
    %246 = arith.mulf %245, %224 : vector<2x11x11xf32>
    %247 = arith.addf %244, %246 : vector<2x11x11xf32>
    %248 = vector.broadcast %52 : f32 to vector<2x11x11xf32>
    %249 = arith.addf %247, %248 : vector<2x11x11xf32>
    %250 = math.tanh %249 : vector<2x11x11xf32>
    %251 = vector.extract_strided_slice %250 {offsets = [0, 0, 0], sizes = [2, 11, 1], strides = [1, 1, 1]} : vector<2x11x11xf32> to vector<2x11x1xf32>
    %252 = vector.extract_strided_slice %250 {offsets = [0, 0, 4], sizes = [2, 11, 1], strides = [1, 1, 1]} : vector<2x11x11xf32> to vector<2x11x1xf32>
    %253 = vector.extract_strided_slice %250 {offsets = [0, 0, 8], sizes = [2, 11, 1], strides = [1, 1, 1]} : vector<2x11x11xf32> to vector<2x11x1xf32>
    %254 = tpu.concatenate %251, %252, %253 in 2 : vector<2x11x1xf32>, vector<2x11x1xf32>, vector<2x11x1xf32> -> vector<2x11x3xf32>
    %255 = vector.extract_strided_slice %254 {offsets = [0, 0, 0], sizes = [2, 1, 3], strides = [1, 1, 1]} : vector<2x11x3xf32> to vector<2x1x3xf32>
    %256 = vector.extract_strided_slice %254 {offsets = [0, 4, 0], sizes = [2, 1, 3], strides = [1, 1, 1]} : vector<2x11x3xf32> to vector<2x1x3xf32>
    %257 = vector.extract_strided_slice %254 {offsets = [0, 8, 0], sizes = [2, 1, 3], strides = [1, 1, 1]} : vector<2x11x3xf32> to vector<2x1x3xf32>
    %258 = tpu.concatenate %255, %256, %257 in 1 : vector<2x1x3xf32>, vector<2x1x3xf32>, vector<2x1x3xf32> -> vector<2x3x3xf32>
    %c0_89 = arith.constant 0 : index
    %c0_90 = arith.constant 0 : index
    %c0_91 = arith.constant 0 : index
    %c0_92 = arith.constant 0 : index
    %259 = vector.load %arg7[%c0_89, %c0_90, %c0_91, %c0_92] : memref<2x1x3x3xf32, #tpu.memory_space<vmem>>, vector<2x1x3x3xf32>
    %260 = vector.shape_cast %259 : vector<2x1x3x3xf32> to vector<2x3x3xf32>
    %261 = vector.shape_cast %258 : vector<2x3x3xf32> to vector<2x1x3x3xf32>
    tpu.vector_store %arg7[%c0_89, %c0_90, %c0_91, %c0_92], %261 {strides = array<i32>} : memref<2x1x3x3xf32, #tpu.memory_space<vmem>>, vector<2x1x3x3xf32>,
    return
  }
}

</mosaic_0001>

<bundles_post_ra>
// kernel: model_tanh_forward.1
= control target key start
LH: loop header
LB: loop body
LE: loop exit
PB: predicated region body
PF: predicated region fallthrough
CT: control target
= control target key end

     0   :  { %13 = vsyncpa [#allocation5], 0  ;;  %s2766_s0 = inlined_call_operand.hbm [shape: f32[2,3,16,16], index: 0, kind: input, shape index: {}]   ;;  %s2767_s1 = inlined_call_operand.vmem [shape: f32[24], index: 1, kind: input, shape index: {}]   ;;  %s2768_s2 = inlined_call_operand.vmem [shape: f32[2], index: 2, kind: input, shape index: {}]   ;;  %s2769_s3 = inlined_call_operand.vmem [shape: f32[16], index: 3, kind: input, shape index: {}]   ;;  %s2770_s4 = inlined_call_operand.vmem [shape: f32[2], index: 4, kind: input, shape index: {}]   ;;  %s2771_s5 = inlined_call_operand.vmem [shape: f32[8], index: 5, kind: input, shape index: {}]   ;;  %s2772_s6 = inlined_call_operand.<no memory space> [shape: f32[1], index: 6, kind: input, shape index: {}]   ;;  %s2773_s7 = inlined_call_operand.vmem [shape: f32[2,1,3,3], index: 7, kind: output, shape index: {}]  }
   0x1   :  { %14 = vsyncpa [#allocation6], 0 }
   0x2   :  { %15 = vsyncpa [#allocation9], 0  ;;  %s45_s26 = sshll.u32 %s2768_s2, 4  ;;  %s46_s26 = int_to_ptr.vmem [resolvable:$true] %s45_s26 }
   0x3   :  { %16 = vsyncpa [#allocation12], 0  ;;  %s65_s29 = sshll.u32 %s2770_s4, 4  ;;  %s1684_s30 = scalar_lea.vmem %s46_s26, 16  ;;  %s66_s29 = int_to_ptr.vmem [resolvable:$true] %s65_s29 }
   0x4   :  { %p1685_p0 = scmp.ne.s32.totalorder %s46_s26, %s1684_s30  ;;  %p1689_p1 = scmp.lt.s32.totalorder %s46_s26, %s46_s26 }
   0x5   :  { %p1690_p2 = scmp.lt.s32.totalorder %s1684_s30, %s1684_s30 }
   0x7   :  { %p1691_p3 = por %p1690_p2, %p1689_p1 }
   0x9   :  { %p1692_p4 = pnand %p1691_p3, %p1685_p0 }
   0xb   :  { %1695 = shalt.err (!%p1692_p4)
}
   0xc   :  { %s1774_s8 = smov [#allocation8]   ;;  %s1696_s9 = scalar_lea.vmem %s66_s29, 16 }
   0xd   :  { %48 = dma.vmem_to_smem %s46_s26, 16, %s1774_s8, [#allocation9]  }
   0xe   :  { %p1697_p5 = scmp.ne.s32.totalorder %s66_s29, %s1696_s9  ;;  %p1701_p6 = scmp.lt.s32.totalorder %s66_s29, %s66_s29 }
   0xf   :  { %p1702_p7 = scmp.lt.s32.totalorder %s1696_s9, %s1696_s9 }
  0x11   :  { %p1703_p8 = por %p1702_p7, %p1701_p6 }
  0x13   :  { %p1704_p9 = pnand %p1703_p8, %p1697_p5 }
  0x15   :  { %1707 = shalt.err (!%p1704_p9)
}
  0x16   :  { %s1775_s2 = smov [#allocation11]   ;;  %s1776_s4 = smov [#allocation4]  }
  0x17   :  { %68 = dma.vmem_to_smem %s66_s29, 16, %s1775_s2, [#allocation12]  }
  0x18   :  { %s22_s10 = sshll.u32 %s1776_s4, 4  ;;  %s35_s13 = sshll.u32 %s2767_s1, 4  ;;  %s23_s10 = int_to_ptr.vmem [resolvable:$true] %s22_s10  ;;  %s36_s13 = int_to_ptr.vmem [resolvable:$true] %s35_s13 }
  0x19   :  { %s1708_s16 = scalar_lea.hbm %s2766_s0, 1536 }
  0x1a   :  { %p1709_p10 = scmp.ne.s32.totalorder %s2766_s0, %s1708_s16  ;;  %p1712_p11 = scmp.lt.u32.totalorder %s1708_s16, %s2766_s0 }
  0x1c   :  { %p1714_p12 = pnand %p1712_p11, %p1709_p10 }
  0x1e   :  { %1717 = shalt.err (!%p1714_p12)
}
  0x1f   :  { %s1718_s21 = scalar_lea.vmem %s23_s10, 1536  ;;  %p1723_p0 = scmp.lt.s32.totalorder %s23_s10, %s23_s10 }
  0x20   :  { %p1719_p13 = scmp.ne.s32.totalorder %s23_s10, %s1718_s21  ;;  %p1724_p1 = scmp.lt.s32.totalorder %s1718_s21, %s1718_s21 }
  0x22   :  { %p1725_p2 = por %p1724_p1, %p1723_p0 }
  0x24   :  { %p1726_p3 = pnand %p1725_p2, %p1719_p13 }
  0x26   :  { %1729 = shalt.err (!%p1726_p3)
}
  0x27   :  { %s1777_s1 = smov 128   ;;  %s1778_s22 = smov 8  }
  0x28   :  { %28 = dma.hbm_to_vmem [thread:$0]  %s2766_s0, 1536, %s23_s10, [#allocation5], %s1777_s1, %s1777_s1, %s1778_s22  }
  0x29   :  { %s1730_s25 = scalar_lea.vmem %s36_s13, 16  ;;  %p1735_p5 = scmp.lt.s32.totalorder %s36_s13, %s36_s13 }
  0x2a   :  { %p1731_p4 = scmp.ne.s32.totalorder %s36_s13, %s1730_s25  ;;  %p1736_p6 = scmp.lt.s32.totalorder %s1730_s25, %s1730_s25 }
  0x2c   :  { %p1737_p7 = por %p1736_p6, %p1735_p5 }
  0x2e   :  { %p1738_p8 = pnand %p1737_p7, %p1731_p4 }
  0x30   :  { %1741 = shalt.err (!%p1738_p8)
}
  0x31   :  { %s1779_s26 = smov [#allocation7]   ;;  %s55_s29 = sshll.u32 %s2769_s3, 4  ;;  %s56_s29 = int_to_ptr.vmem [resolvable:$true] %s55_s29 }
  0x32   :  { %38 = dma.vmem_to_smem %s36_s13, 16, %s1779_s26, [#allocation6]  }
  0x33   :  { %s75_s9 = sshll.u32 %s2771_s5, 4  ;;  %s1742_s0 = scalar_lea.vmem %s56_s29, 16  ;;  %s76_s9 = int_to_ptr.vmem [resolvable:$true] %s75_s9 }
  0x34   :  { %p1743_p9 = scmp.ne.s32.totalorder %s56_s29, %s1742_s0  ;;  %p1747_p10 = scmp.lt.s32.totalorder %s56_s29, %s56_s29 }
  0x35   :  { %p1748_p11 = scmp.lt.s32.totalorder %s1742_s0, %s1742_s0 }
  0x37   :  { %p1749_p12 = por %p1748_p11, %p1747_p10 }
  0x39   :  { %p1750_p13 = pnand %p1749_p12, %p1743_p9 }
  0x3b   :  { %1753 = shalt.err (!%p1750_p13)
}
  0x3c   :  { %s1780_s2 = smov [#allocation10]   ;;  %s1754_s4 = scalar_lea.vmem %s76_s9, 16 }
  0x3d   :  { %58 = dma.vmem_to_smem %s56_s29, 16, %s1780_s2, [#allocation9]  }
  0x3e   :  { %p1755_p0 = scmp.ne.s32.totalorder %s76_s9, %s1754_s4  ;;  %p1759_p1 = scmp.lt.s32.totalorder %s76_s9, %s76_s9 }
  0x3f   :  { %p1760_p2 = scmp.lt.s32.totalorder %s1754_s4, %s1754_s4 }
  0x41   :  { %p1761_p3 = por %p1760_p2, %p1759_p1 }
  0x43   :  { %p1762_p4 = pnand %p1761_p3, %p1755_p0 }
  0x45   :  { %1765 = shalt.err (!%p1762_p4)
}
  0x46   :  { %s1781_s3 = smov [#allocation13]  }
  0x47   :  { %78 = dma.vmem_to_smem %s76_s9, 16, %s1781_s3, [#allocation12]  }
  0x48   :  { %1766 = dma.done.wait [#allocation5], 1536  }
  0x49   :  { %1767 = vsyncadd [#allocation5], 4294965760 }
  0x4a   :  { %1768 = dma.done.wait [#allocation6], 16  }
  0x4b   :  { %1769 = vsyncadd [#allocation6], 4294967280 }
  0x4c   :  { %1770 = dma.done.wait [#allocation9], 32  }
  0x4d   :  { %1771 = vsyncadd [#allocation9], 4294967264 }
  0x4e   :  { %1772 = dma.done.wait [#allocation12], 32  }
  0x4f   :  { %1773 = vsyncadd [#allocation12], 4294967264 }
  0x50   :  { %99 = sfence }
  0x51   :  { %v174_v0 = vld [vmem:[#allocation4 + $0x8] sm:$0xff]  ;;  %v173_v1 = vld [vmem:[#allocation4] sm:$0xff]  ;;  %s1782_s5 = smov 1   ;;  %vm156_vm0 = vcmask 140288   ;;  %v180_v2 = vld [vmem:[#allocation4 + $0x38] sm:$0xff]  ;;  %v1783_v4 = vmov 0.0  }
  0x52   :  { %199 = vrot.lane.b32.xlu1 %v174_v0, %s1782_s5  ;;  %197 = vrot.lane.b32.xlu0 %v173_v1, %s1782_s5  ;;  %v179_v3 = vld [vmem:[#allocation4 + $0x30] sm:$0xff]  ;;  %157 = vst.msk [vmem:[#allocation2 + $0x10] sm:$0x3] %vm156_vm0, %v1783_v4  ;;  %160 = vst.msk [vmem:[#allocation2 + $0x28] sm:$0x3] %vm156_vm0, %v1783_v4  ;;  %vm153_vm1 = vcmask 146432  }
  0x53   :  { %163 = vst.msk [vmem:[#allocation2 + $0x40] sm:$0x3] %vm156_vm0, %v1783_v4  ;;  %166 = vst.msk [vmem:[#allocation2 + $0x58] sm:$0x3] %vm156_vm0, %v1783_v4  ;;  %v181_v5 = vld [vmem:[#allocation4 + $0x40] sm:$0xff]  ;;  %v175_v6 = vld [vmem:[#allocation4 + $0x10] sm:$0xff] }
  0x54   :  { %169 = vst.msk [vmem:[#allocation2 + $0x70] sm:$0x3] %vm156_vm0, %v1783_v4  ;;  %172 = vst.msk [vmem:[#allocation2 + $0x88] sm:$0x3] %vm156_vm0, %v1783_v4  ;;  %v182_v7 = vld [vmem:[#allocation4 + $0x48] sm:$0xff]  ;;  %v176_v8 = vld [vmem:[#allocation4 + $0x18] sm:$0xff] }
  0x55   :  { %155 = vst.msk [vmem:[#allocation2 + $0x8] sm:$0xff] %vm153_vm1, %v1783_v4  ;;  %154 = vst.msk [vmem:[#allocation2] sm:$0xff] %vm153_vm1, %v1783_v4  ;;  %s1576_s10 = sld [smem:[#allocation7 + $0x3]]  ;;  %v183_v9 = vld [vmem:[#allocation4 + $0x50] sm:$0xff]  ;;  %v177_v10 = vld [vmem:[#allocation4 + $0x20] sm:$0xff]  ;;  %s1580_s11 = sld [smem:[#allocation7 + $0x7]] }
  0x56   :  { %158 = vst.msk [vmem:[#allocation2 + $0x18] sm:$0xff] %vm153_vm1, %v1783_v4  ;;  %159 = vst.msk [vmem:[#allocation2 + $0x20] sm:$0xff] %vm153_vm1, %v1783_v4  ;;  %211 = vrot.lane.b32.xlu1 %v180_v2, %s1782_s5  ;;  %209 = vrot.lane.b32.xlu0 %v179_v3, %s1782_s5  ;;  %v184_v11 = vld [vmem:[#allocation4 + $0x58] sm:$0xff]  ;;  %v178_v12 = vld [vmem:[#allocation4 + $0x28] sm:$0xff]  ;;  %s1588_s12 = sld [smem:[#allocation7 + $0xf]]  ;;  %s1784_s13 = smov 127  }
  0x57   :  { %161 = vst.msk [vmem:[#allocation2 + $0x30] sm:$0xff] %vm153_vm1, %v1783_v4  ;;  %162 = vst.msk [vmem:[#allocation2 + $0x38] sm:$0xff] %vm153_vm1, %v1783_v4  ;;  %vm233_vm2 = vcmask 138248   ;;  %s1574_s14 = sld [smem:[#allocation7 + $0x1]]  ;;  %s100_s15 = sld [smem:[#allocation7]]  ;;  %vm941_vm3 = vcmask 1045504  }
  0x58   :  { %164 = vst.msk [vmem:[#allocation2 + $0x48] sm:$0xff] %vm153_vm1, %v1783_v4  ;;  %165 = vst.msk [vmem:[#allocation2 + $0x50] sm:$0xff] %vm153_vm1, %v1783_v4  ;;  %s1578_s16 = sld [smem:[#allocation7 + $0x5]]  ;;  %s1577_s17 = sld [smem:[#allocation7 + $0x4]]  ;;  %vm1364_vm4 = vcmask 1043456   ;;  %vm1535_vm5 = vcmask 7168  }
  0x59   :  { %167 = vst.msk [vmem:[#allocation2 + $0x60] sm:$0xff] %vm153_vm1, %v1783_v4  ;;  %168 = vst.msk [vmem:[#allocation2 + $0x68] sm:$0xff] %vm153_vm1, %v1783_v4  ;;  %v1866_v13 = vld [vmem:[#allocation2 + $0x11] sm:$0x1]  ;;  %v1878_v18 = vld [vmem:[#allocation2 + $0x29] sm:$0x1] }
  0x5a   :  { %170 = vst.msk [vmem:[#allocation2 + $0x78] sm:$0xff] %vm153_vm1, %v1783_v4  ;;  %171 = vst.msk [vmem:[#allocation2 + $0x80] sm:$0xff] %vm153_vm1, %v1783_v4  ;;  %213 = vrot.lane.b32.xlu1 %v181_v5, %s1782_s5  ;;  %201 = vrot.lane.b32.xlu0 %v175_v6, %s1782_s5  ;;  %v1870_v15 = vld [vmem:[#allocation2 + $0x59] sm:$0x1]  ;;  %s1586_s18 = sld [smem:[#allocation7 + $0xd]]  ;;  %s1581_s19 = sld [smem:[#allocation7 + $0x8]] }
  0x5b   :  { %v1868_v14 = vstv %s1576_s10  ;;  %v1880_v19 = vstv %s1580_s11  ;;  %v1882_v20 = vld [vmem:[#allocation2 + $0x71] sm:$0x1]  ;;  %s1582_s20 = sld [smem:[#allocation7 + $0x9]]  ;;  %s1584_s1 = sld [smem:[#allocation7 + $0xb]]  ;;  %vm1540_vm6 = vcmask 15360   ;;  %vm1557_vm7 = vcmask 1040384  }
  0x5c   :  { %v344_v16 = vmul.f32 %v1868_v14, %v1866_v13  ;;  %v347_v17 = vmul.f32 %v1868_v14, %v1870_v15  ;;  %v444_v21 = vmul.f32 %v1880_v19, %v1878_v18  ;;  %v447_v22 = vmul.f32 %v1880_v19, %v1882_v20  ;;  %s1590_s21 = sld [smem:[#allocation7 + $0x11]]  ;;  %s1592_s22 = sld [smem:[#allocation7 + $0x13]] }
  0x5d   :  { %v1890_v23 = vstv %s1588_s12  ;;  %v291_v30 = vstv %s1574_s14  ;;  %v1926_v44 = vstv %s100_s15  ;;  %s1594_s23 = sld [smem:[#allocation7 + $0x15]]  ;;  %s1575_s24 = sld [smem:[#allocation7 + $0x2]]  ;;  %vm1560_vm8 = vcmask 1041408  }
  0x5e   :  { %215 = vrot.lane.b32.xlu1 %v182_v7, %s1782_s5  ;;  %203 = vrot.lane.b32.xlu0 %v176_v8, %s1782_s5  ;;  %v651_v24 = vmul.f32 %v1890_v23, %v1866_v13  ;;  %v654_v25 = vmul.f32 %v1890_v23, %v1870_v15  ;;  %v391_v58 = vstv %s1578_s16  ;;  %v1961_v63 = vstv %s1577_s17  ;;  %s1596_s25 = sld [smem:[#allocation7 + $0x17]]  ;;  %s1579_s26 = sld [smem:[#allocation7 + $0x6]] }
  0x5f   :  { %s1585_s27 = sld [smem:[#allocation7 + $0xc]]  ;;  %s1587_s28 = sld [smem:[#allocation7 + $0xe]]  ;;  %vm1563_vm9 = vcmask 18432  }
  0x60   :  { %v598_v4 = vstv %s1586_s18  ;;  %s1589_s29 = sld [smem:[#allocation7 + $0x10]]  ;;  %s1583_s30 = sld [smem:[#allocation7 + $0xa]] }
  0x61   :  { %s1591_s8 = sld [smem:[#allocation7 + $0x12]]  ;;  %s148_s9 = sld [smem:[#allocation8]] }
  0x62   :  { %217 = vrot.lane.b32.xlu1 %v183_v9, %s1782_s5  ;;  %205 = vrot.lane.b32.xlu0 %v177_v10, %s1782_s5  ;;  %v1984_v9 = vstv %s1581_s19  ;;  %s1593_s0 = sld [smem:[#allocation7 + $0x14]]  ;;  %s1597_s2 = sld [smem:[#allocation10 + $0x1]] }
  0x63   :  { %s1595_s4 = sld [smem:[#allocation7 + $0x16]]  ;;  %s1599_s3 = sld [smem:[#allocation10 + $0x3]] }
  0x64   :  { %s2273_s10 = sld [smem:[#allocation10 + $0x2]]  ;;  %s2281_s12 = sld [smem:[#allocation8 + $0x1]] }
  0x65   :  { %s2277_s11 = sld [smem:[#allocation10 + $0xa]]  ;;  %s2439_s14 = sld [smem:[#allocation10 + $0x5]] }
  0x66   :  { %219 = vrot.lane.b32.xlu1 %v184_v11, %s1782_s5  ;;  %207 = vrot.lane.b32.xlu0 %v178_v12, %s1782_s5  ;;  %s1607_s5 = sld [smem:[#allocation10 + $0xb]]  ;;  %s2446_s15 = sld [smem:[#allocation10 + $0x7]] }
  0x67   :  { %s1611_s16 = sld [smem:[#allocation10 + $0xf]]  ;;  %s1602_s17 = sld [smem:[#allocation10 + $0x6]] }
  0x68   :  { %s1605_s18 = sld [smem:[#allocation10 + $0x9]]  ;;  %s1609_s19 = sld [smem:[#allocation10 + $0xd]] }
  0x6a   :  { %358 = vrot.lane.b32.xlu0 %v344_v16, %s1784_s13  ;;  %364 = vrot.lane.b32.xlu1 %v347_v17, %s1784_s13 }
  0x6e   :  { %458 = vrot.lane.b32.xlu0 %v444_v21, %s1784_s13  ;;  %464 = vrot.lane.b32.xlu1 %v447_v22, %s1784_s13 }
  0x72   :  { %665 = vrot.lane.b32.xlu0 %v651_v24, %s1784_s13  ;;  %671 = vrot.lane.b32.xlu1 %v654_v25, %s1784_s13 }
  0xc4   :  { %v200_v26 = vpop.permute.xlu1 %199  ;;  %v198_v27 = vpop.permute.xlu0 %197 }
  0xc5   :  { %235 = vst.msk [vmem:[#allocation2 + $0x9] sm:$0xff] %vm233_vm2, %v200_v26  ;;  %234 = vst.msk [vmem:[#allocation2 + $0x1] sm:$0xff] %vm233_vm2, %v198_v27 }
  0xc8   :  { %v212_v28 = vpop.permute.xlu1 %211  ;;  %v210_v29 = vpop.permute.xlu0 %209 }
  0xc9   :  { %241 = vst.msk [vmem:[#allocation2 + $0x51] sm:$0xff] %vm233_vm2, %v212_v28  ;;  %240 = vst.msk [vmem:[#allocation2 + $0x49] sm:$0xff] %vm233_vm2, %v210_v29 }
  0xcc   :  { %v1904_v31 = vld [vmem:[#allocation2] sm:$0xff]  ;;  %v214_v32 = vpop.permute.xlu1 %213  ;;  %v202_v33 = vpop.permute.xlu0 %201  ;;  %v1909_v35 = vld [vmem:[#allocation2 + $0x8] sm:$0xff]  ;;  %v1922_v43 = vld [vmem:[#allocation2 + $0x10] sm:$0x1] }
  0xcd   :  { %v292_v34 = vmul.f32 %v291_v30, %v1904_v31  ;;  %242 = vst.msk [vmem:[#allocation2 + $0x61] sm:$0xff] %vm233_vm2, %v214_v32  ;;  %236 = vst.msk [vmem:[#allocation2 + $0x19] sm:$0xff] %vm233_vm2, %v202_v33  ;;  %v293_v40 = vmul.f32 %v291_v30, %v1909_v35  ;;  %v294_v49 = vmul.f32 %v291_v30, %v1922_v43  ;;  %v1936_v50 = vld [vmem:[#allocation2 + $0x1] sm:$0xff]  ;;  %v1947_v56 = vld [vmem:[#allocation2 + $0x9] sm:$0xff] }
  0xce   :  { %v342_v54 = vmul.f32 %v1868_v14, %v1936_v50  ;;  %v343_v61 = vmul.f32 %v1868_v14, %v1947_v56  ;;  %v599_v6 = vmul.f32 %v598_v4, %v1904_v31  ;;  %v600_v17 = vmul.f32 %v598_v4, %v1909_v35 }
  0xcf   :  { %304 = vrot.lane.b32.xlu0 %v292_v34, %s1784_s13  ;;  %v601_v26 = vmul.f32 %v598_v4, %v1922_v43  ;;  %v649_v33 = vmul.f32 %v1890_v23, %v1936_v50 }
  0xd0   :  { %v1912_v36 = vld [vmem:[#allocation2 + $0x48] sm:$0xff]  ;;  %v216_v37 = vpop.permute.xlu1 %215  ;;  %v204_v38 = vpop.permute.xlu0 %203  ;;  %v1916_v41 = vld [vmem:[#allocation2 + $0x58] sm:$0x1]  ;;  %v1920_v42 = vld [vmem:[#allocation2 + $0x50] sm:$0xff] }
  0xd1   :  { %v295_v39 = vmul.f32 %v291_v30, %v1912_v36  ;;  %243 = vst.msk [vmem:[#allocation2 + $0x69] sm:$0xff] %vm233_vm2, %v216_v37  ;;  %237 = vst.msk [vmem:[#allocation2 + $0x21] sm:$0xff] %vm233_vm2, %v204_v38  ;;  %v1930_v47 = vmul.f32 %v1926_v44, %v1916_v41  ;;  %v296_v48 = vmul.f32 %v291_v30, %v1920_v42  ;;  %v1945_v55 = vld [vmem:[#allocation2 + $0x49] sm:$0xff]  ;;  %v1959_v62 = vld [vmem:[#allocation2 + $0x51] sm:$0xff] }
  0xd2   :  { %v297_v53 = vmul.f32 %v291_v30, %v1916_v41  ;;  %v345_v60 = vmul.f32 %v1868_v14, %v1945_v55  ;;  %v346_v3 = vmul.f32 %v1868_v14, %v1959_v62  ;;  %v602_v11 = vmul.f32 %v598_v4, %v1912_v36 }
  0xd3   :  { %310 = vrot.lane.b32.xlu1 %v295_v39, %s1784_s13  ;;  %306 = vrot.lane.b32.xlu0 %v293_v40, %s1784_s13  ;;  %v603_v22 = vmul.f32 %v598_v4, %v1920_v42  ;;  %v604_v28 = vmul.f32 %v598_v4, %v1916_v41  ;;  %v652_v37 = vmul.f32 %v1890_v23, %v1945_v55 }
  0xd4   :  { %v218_v45 = vpop.permute.xlu1 %217  ;;  %v206_v46 = vpop.permute.xlu0 %205  ;;  %v1951_v57 = vld [vmem:[#allocation2 + $0x18] sm:$0xff]  ;;  %v1970_v2 = vld [vmem:[#allocation2 + $0x60] sm:$0xff] }
  0xd5   :  { %244 = vst.msk [vmem:[#allocation2 + $0x79] sm:$0xff] %vm233_vm2, %v218_v45  ;;  %238 = vst.msk [vmem:[#allocation2 + $0x31] sm:$0xff] %vm233_vm2, %v206_v46  ;;  %v392_v0 = vmul.f32 %v391_v58, %v1951_v57  ;;  %v395_v5 = vmul.f32 %v391_v58, %v1970_v2  ;;  %v2008_v27 = vld [vmem:[#allocation2 + $0x19] sm:$0xff]  ;;  %v2015_v30 = vld [vmem:[#allocation2 + $0x61] sm:$0xff]  ;;  %v491_v45 = vstv %s1582_s20  ;;  %s1610_s20 = sld [smem:[#allocation10 + $0xe]] }
  0xd6   :  { %v442_v29 = vmul.f32 %v1880_v19, %v2008_v27  ;;  %v445_v32 = vmul.f32 %v1880_v19, %v2015_v30 }
  0xd7   :  { %312 = vrot.lane.b32.xlu1 %v296_v48, %s1784_s13  ;;  %308 = vrot.lane.b32.xlu0 %v294_v49, %s1784_s13  ;;  %v650_v48 = vmul.f32 %v1890_v23, %v1947_v56 }
  0xd8   :  { %v220_v51 = vpop.permute.xlu1 %219  ;;  %v208_v52 = vpop.permute.xlu0 %207  ;;  %v1953_v59 = vld [vmem:[#allocation2 + $0x70] sm:$0x1]  ;;  %v1980_v8 = vld [vmem:[#allocation2 + $0x20] sm:$0xff]  ;;  %v1992_v14 = vld [vmem:[#allocation2 + $0x68] sm:$0xff] }
  0xd9   :  { %245 = vst.msk [vmem:[#allocation2 + $0x81] sm:$0xff] %vm233_vm2, %v220_v51  ;;  %239 = vst.msk [vmem:[#allocation2 + $0x39] sm:$0xff] %vm233_vm2, %v208_v52  ;;  %v1968_v1 = vmul.f32 %v1961_v63, %v1953_v59  ;;  %v393_v12 = vmul.f32 %v391_v58, %v1980_v8  ;;  %v396_v16 = vmul.f32 %v391_v58, %v1992_v14  ;;  %v1998_v21 = vld [vmem:[#allocation2 + $0x28] sm:$0x1]  ;;  %v2031_v39 = vld [vmem:[#allocation2 + $0x69] sm:$0xff] }
  0xda   :  { %v394_v24 = vmul.f32 %v391_v58, %v1998_v21  ;;  %v397_v25 = vmul.f32 %v391_v58, %v1953_v59  ;;  %v2023_v34 = vld [vmem:[#allocation2 + $0x21] sm:$0xff]  ;;  %v446_v46 = vmul.f32 %v1880_v19, %v2031_v39  ;;  %v653_v52 = vmul.f32 %v1890_v23, %v1959_v62 }
  0xdb   :  { %314 = vrot.lane.b32.xlu1 %v297_v53, %s1784_s13  ;;  %354 = vrot.lane.b32.xlu0 %v342_v54, %s1784_s13  ;;  %v443_v38 = vmul.f32 %v1880_v19, %v2023_v34  ;;  %v698_v53 = vstv %s1590_s21  ;;  %s124_s21 = sld [smem:[#allocation10]] }
  0xdc   :  { %v2035_v40 = vld [vmem:[#allocation2 + $0x30] sm:$0xff]  ;;  %v2044_v51 = vld [vmem:[#allocation2 + $0x78] sm:$0xff]  ;;  %v699_v54 = vmul.f32 %v698_v53, %v1951_v57 }
  0xdd   :  { %v492_v49 = vmul.f32 %v491_v45, %v2035_v40  ;;  %v495_v19 = vmul.f32 %v491_v45, %v2044_v51 }
  0xdf   :  { %360 = vrot.lane.b32.xlu1 %v345_v60, %s1784_s13  ;;  %356 = vrot.lane.b32.xlu0 %v343_v61, %s1784_s13  ;;  %v702_v60 = vmul.f32 %v698_v53, %v1970_v2 }
  0xe0   :  { %v1978_v7 = vld [vmem:[#allocation2 + $0x88] sm:$0x1]  ;;  %v2052_v58 = vld [vmem:[#allocation2 + $0x38] sm:$0xff]  ;;  %v2058_v23 = vld [vmem:[#allocation2 + $0x80] sm:$0xff] }
  0xe1   :  { %2783 = vst [vmem:[#allocation18_spill] sm:$0xff] %v1978_v7  ;;  %v1988_v10 = vmul.f32 %v1984_v9, %v1978_v7  ;;  %2784 = vst [vmem:[#allocation19_spill] sm:$0xff] %v2052_v58  ;;  %v493_v61 = vmul.f32 %v491_v45, %v2052_v58  ;;  %v2064_v4 = vld [vmem:[#allocation2 + $0x40] sm:$0x1] }
  0xe2   :  { %2785 = vst [vmem:[#allocation20_spill] sm:$0xff] %v2058_v23 }
  0xe3   :  { %362 = vrot.lane.b32.xlu1 %v346_v3, %s1784_s13  ;;  %404 = vrot.lane.b32.xlu0 %v392_v0, %s1784_s13  ;;  %v496_v0 = vmul.f32 %v491_v45, %v2058_v23  ;;  %v700_v3 = vmul.f32 %v698_v53, %v1980_v8 }
  0xe7   :  { %410 = vrot.lane.b32.xlu1 %v395_v5, %s1784_s13  ;;  %611 = vrot.lane.b32.xlu0 %v599_v6, %s1784_s13  ;;  %v703_v5 = vmul.f32 %v698_v53, %v1992_v14  ;;  %v494_v6 = vmul.f32 %v491_v45, %v2064_v4 }
  0xeb   :  { %617 = vrot.lane.b32.xlu1 %v602_v11, %s1784_s13  ;;  %406 = vrot.lane.b32.xlu0 %v393_v12, %s1784_s13  ;;  %v497_v11 = vmul.f32 %v491_v45, %v1978_v7  ;;  %v701_v12 = vmul.f32 %v698_v53, %v1998_v21  ;;  %v2096_v45 = vld [vmem:[#allocation2 + $0x41] sm:$0x1] }
  0xef   :  { %412 = vrot.lane.b32.xlu1 %v396_v16, %s1784_s13  ;;  %613 = vrot.lane.b32.xlu0 %v600_v17, %s1784_s13  ;;  %v2074_v16 = vld [vmem:[#allocation2 + $0x31] sm:$0xff]  ;;  %v541_v17 = vstv %s1584_s1  ;;  %s1604_s1 = sld [smem:[#allocation10 + $0x8]] }
  0xf0   :  { %2786 = vst [vmem:[#allocation21_spill] sm:$0xff] %v2074_v16 }
  0xf3   :  { %619 = vrot.lane.b32.xlu1 %v603_v22, %s1784_s13  ;;  %408 = vrot.lane.b32.xlu0 %v394_v24, %s1784_s13  ;;  %v704_v22 = vmul.f32 %v698_v53, %v1953_v59  ;;  %v542_v24 = vmul.f32 %v541_v17, %v2074_v16  ;;  %v2105_v53 = vld [vmem:[#allocation2 + $0x89] sm:$0x1] }
  0xf7   :  { %414 = vrot.lane.b32.xlu1 %v397_v25, %s1784_s13  ;;  %615 = vrot.lane.b32.xlu0 %v601_v26, %s1784_s13  ;;  %v2080_v25 = vld [vmem:[#allocation2 + $0x79] sm:$0xff]  ;;  %v748_v26 = vstv %s1592_s22  ;;  %s1600_s22 = sld [smem:[#allocation10 + $0x4]] }
  0xf8   :  { %2787 = vst [vmem:[#allocation22_spill] sm:$0xff] %v2080_v25 }
  0xfb   :  { %621 = vrot.lane.b32.xlu1 %v604_v28, %s1784_s13  ;;  %454 = vrot.lane.b32.xlu0 %v442_v29, %s1784_s13  ;;  %v545_v28 = vmul.f32 %v541_v17, %v2080_v25  ;;  %v749_v29 = vmul.f32 %v748_v26, %v2008_v27 }
  0xff   :  { %460 = vrot.lane.b32.xlu1 %v445_v32, %s1784_s13  ;;  %661 = vrot.lane.b32.xlu0 %v649_v33, %s1784_s13  ;;  %v2086_v32 = vld [vmem:[#allocation2 + $0x39] sm:$0xff]  ;;  %v752_v33 = vmul.f32 %v748_v26, %v2015_v30 }
 0x103   :  { %667 = vrot.lane.b32.xlu1 %v652_v37, %s1784_s13  ;;  %456 = vrot.lane.b32.xlu0 %v443_v38, %s1784_s13  ;;  %v543_v37 = vmul.f32 %v541_v17, %v2086_v32  ;;  %v2092_v38 = vld [vmem:[#allocation2 + $0x81] sm:$0xff] }
 0x107   :  { %462 = vrot.lane.b32.xlu1 %v446_v46, %s1784_s13  ;;  %663 = vrot.lane.b32.xlu0 %v650_v48, %s1784_s13  ;;  %v546_v46 = vmul.f32 %v541_v17, %v2092_v38  ;;  %v750_v48 = vmul.f32 %v748_v26, %v2023_v34 }
 0x10b   :  { %669 = vrot.lane.b32.xlu1 %v653_v52, %s1784_s13  ;;  %504 = vrot.lane.b32.xlu0 %v492_v49, %s1784_s13  ;;  %v544_v49 = vmul.f32 %v541_v17, %v2096_v45  ;;  %v2103_v52 = vpop.permute.xlu0 %358 }
 0x10f   :  { %510 = vrot.lane.b32.xlu1 %v495_v19, %s1784_s13  ;;  %711 = vrot.lane.b32.xlu0 %v699_v54, %s1784_s13  ;;  %v753_v19 = vmul.f32 %v748_v26, %v2031_v39  ;;  %v547_v54 = vmul.f32 %v541_v17, %v2105_v53 }
 0x113   :  { %717 = vrot.lane.b32.xlu1 %v702_v60, %s1784_s13  ;;  %506 = vrot.lane.b32.xlu0 %v493_v61, %s1784_s13  ;;  %v751_v60 = vmul.f32 %v748_v26, %v1878_v18  ;;  %v2112_v61 = vpop.permute.xlu1 %364 }
 0x117   :  { %512 = vrot.lane.b32.xlu1 %v496_v0, %s1784_s13  ;;  %713 = vrot.lane.b32.xlu0 %v700_v3, %s1784_s13  ;;  %v2114_v0 = vpop.permute.xlu0 %458  ;;  %v798_v3 = vstv %s1594_s23  ;;  %s150_s23 = sld [smem:[#allocation11]] }
 0x118   :  { %v802_v17 = vmul.f32 %v798_v3, %v2044_v51 }
 0x11b   :  { %719 = vrot.lane.b32.xlu1 %v703_v5, %s1784_s13  ;;  %508 = vrot.lane.b32.xlu0 %v494_v6, %s1784_s13  ;;  %v754_v5 = vmul.f32 %v748_v26, %v1882_v20  ;;  %v799_v6 = vmul.f32 %v798_v3, %v2035_v40  ;;  %v328_v26 = vstv %s1575_s24  ;;  %s1608_s24 = sld [smem:[#allocation10 + $0xc]] }
 0x11f   :  { %514 = vrot.lane.b32.xlu1 %v497_v11, %s1784_s13  ;;  %715 = vrot.lane.b32.xlu0 %v701_v12, %s1784_s13  ;;  %v2120_v11 = vpop.permute.xlu1 %464  ;;  %v2124_v12 = vpop.permute.xlu0 %665 }
 0x123   :  { %721 = vrot.lane.b32.xlu1 %v704_v22, %s1784_s13  ;;  %554 = vrot.lane.b32.xlu0 %v542_v24, %s1784_s13  ;;  %v800_v22 = vmul.f32 %v798_v3, %v2052_v58  ;;  %v2130_v24 = vpop.permute.xlu1 %671 }
 0x127   :  { %560 = vrot.lane.b32.xlu1 %v545_v28, %s1784_s13  ;;  %761 = vrot.lane.b32.xlu0 %v749_v29, %s1784_s13  ;;  %v285_v28 = vmul.f32 %v1926_v44, %v1904_v31 }
 0x12b   :  { %767 = vrot.lane.b32.xlu1 %v752_v33, %s1784_s13  ;;  %556 = vrot.lane.b32.xlu0 %v543_v37, %s1784_s13  ;;  %v803_v33 = vmul.f32 %v798_v3, %v2058_v23  ;;  %v801_v37 = vmul.f32 %v798_v3, %v2064_v4  ;;  %v332_v23 = vmul.f32 %v328_v26, %v1945_v55 }
 0x12f   :  { %562 = vrot.lane.b32.xlu1 %v546_v46, %s1784_s13  ;;  %763 = vrot.lane.b32.xlu0 %v750_v48, %s1784_s13  ;;  %v848_v48 = vstv %s1596_s25  ;;  %s1612_s25 = sld [smem:[#allocation13 + $0x1]] }
 0x130   :  { %v851_v58 = vmul.f32 %v848_v48, %v2096_v45 }
 0x133   :  { %769 = vrot.lane.b32.xlu1 %v753_v19, %s1784_s13  ;;  %558 = vrot.lane.b32.xlu0 %v544_v49, %s1784_s13  ;;  %v329_v49 = vmul.f32 %v328_v26, %v1936_v50  ;;  %v288_v19 = vmul.f32 %v1926_v44, %v1912_v36 }
 0x137   :  { %564 = vrot.lane.b32.xlu1 %v547_v54, %s1784_s13  ;;  %765 = vrot.lane.b32.xlu0 %v751_v60, %s1784_s13  ;;  %v286_v54 = vmul.f32 %v1926_v44, %v1909_v35 }
 0x13b   :  { %771 = vrot.lane.b32.xlu1 %v754_v5, %s1784_s13  ;;  %811 = vrot.lane.b32.xlu0 %v799_v6, %s1784_s13 }
 0x13f   :  { %817 = vrot.lane.b32.xlu1 %v802_v17, %s1784_s13  ;;  %813 = vrot.lane.b32.xlu0 %v800_v22, %s1784_s13  ;;  %v804_v17 = vmul.f32 %v798_v3, %v1978_v7  ;;  %v849_v22 = vmul.f32 %v848_v48, %v2074_v16  ;;  %v287_v3 = vmul.f32 %v1926_v44, %v1922_v43 }
 0x141   :  { %v305_v29 = vpop.permute.xlu0 %304 }
 0x142   :  { %v322_v46 = vadd.f32 %v305_v29, %v285_v28 }
 0x143   :  { %819 = vrot.lane.b32.xlu1 %v803_v33, %s1784_s13  ;;  %815 = vrot.lane.b32.xlu0 %v801_v37, %s1784_s13  ;;  %v330_v33 = vmul.f32 %v328_v26, %v1947_v56  ;;  %v331_v37 = vmul.f32 %v328_v26, %v1866_v13 }
 0x144   :  { %v335_v60 = vadd.f32 %v329_v49, %v322_v46  ;;  %v289_v46 = vmul.f32 %v1926_v44, %v1920_v42 }
 0x145   :  { %v311_v5 = vpop.permute.xlu1 %310  ;;  %v307_v6 = vpop.permute.xlu0 %306 }
 0x146   :  { %v325_v28 = vadd.f32 %v311_v5, %v288_v19  ;;  %v323_v29 = vadd.f32 %v307_v6, %v286_v54  ;;  %v852_v5 = vmul.f32 %v848_v48, %v2080_v25  ;;  %v850_v6 = vmul.f32 %v848_v48, %v2086_v32 }
 0x147   :  { %821 = vrot.lane.b32.xlu1 %v804_v17, %s1784_s13  ;;  %861 = vrot.lane.b32.xlu0 %v849_v22, %s1784_s13  ;;  %v333_v22 = vmul.f32 %v328_v26, %v1959_v62  ;;  %v853_v25 = vmul.f32 %v848_v48, %v2092_v38 }
 0x148   :  { %v338_v49 = vadd.f32 %v332_v23, %v325_v28  ;;  %v336_v7 = vadd.f32 %v330_v33, %v323_v29  ;;  %v334_v23 = vmul.f32 %v328_v26, %v1870_v15 }
 0x149   :  { %v313_v19 = vpop.permute.xlu1 %312  ;;  %v309_v54 = vpop.permute.xlu0 %308 }
 0x14a   :  { %v326_v16 = vadd.f32 %v313_v19, %v289_v46  ;;  %v324_v17 = vadd.f32 %v309_v54, %v287_v3  ;;  %v379_v46 = vmul.f32 %v1961_v63, %v1951_v57  ;;  %v381_v54 = vmul.f32 %v1961_v63, %v1998_v21 }
 0x14b   :  { %867 = vrot.lane.b32.xlu1 %v852_v5, %s1784_s13  ;;  %863 = vrot.lane.b32.xlu0 %v850_v6, %s1784_s13 }
 0x14c   :  { %v337_v44 = vadd.f32 %v331_v37, %v324_v17  ;;  %v339_v28 = vadd.f32 %v333_v22, %v326_v16  ;;  %v854_v16 = vmul.f32 %v848_v48, %v2105_v53 }
 0x14d   :  { %v315_v29 = vpop.permute.xlu1 %314  ;;  %v355_v33 = vpop.permute.xlu0 %354 }
 0x14e   :  { %v327_v3 = vadd.f32 %v315_v29, %v1930_v47  ;;  %v372_v19 = vadd.f32 %v355_v33, %v335_v60  ;;  %v374_v5 = vadd.f32 %v2103_v52, %v337_v44  ;;  %v382_v47 = vmul.f32 %v1961_v63, %v1970_v2 }
 0x14f   :  { %869 = vrot.lane.b32.xlu1 %v853_v25, %s1784_s13  ;;  %865 = vrot.lane.b32.xlu0 %v851_v58, %s1784_s13  ;;  %v380_v52 = vmul.f32 %v1961_v63, %v1980_v8  ;;  %v428_v58 = vstv %s1579_s26  ;;  %s1620_s26 = sld [smem:[#allocation11 + $0x1]] }
 0x150   :  { %v340_v26 = vadd.f32 %v334_v23, %v327_v3  ;;  %v385_v37 = vadd.f32 %v379_v46, %v372_v19  ;;  %v387_v6 = vadd.f32 %v381_v54, %v374_v5  ;;  %v591_v3 = vstv %s1585_s27  ;;  %s1614_s27 = sld [smem:[#allocation13 + $0x3]] }
 0x151   :  { %v361_v17 = vpop.permute.xlu1 %360  ;;  %v357_v22 = vpop.permute.xlu0 %356  ;;  %v635_v5 = vstv %s1587_s28  ;;  %s1613_s28 = sld [smem:[#allocation13 + $0x2]] }
 0x152   :  { %v375_v60 = vadd.f32 %v361_v17, %v338_v49  ;;  %v373_v29 = vadd.f32 %v357_v22, %v336_v7  ;;  %v377_v25 = vadd.f32 %v2112_v61, %v340_v26  ;;  %v383_v7 = vmul.f32 %v1961_v63, %v1992_v14 }
 0x153   :  { %871 = vrot.lane.b32.xlu1 %v854_v16, %s1784_s13  ;;  %v429_v49 = vmul.f32 %v428_v58, %v2008_v27  ;;  %v592_v61 = vmul.f32 %v591_v3, %v1904_v31  ;;  %v639_v31 = vmul.f32 %v635_v5, %v1945_v55  ;;  %s1785_s13 = smov 126  }
 0x154   :  { %v388_v48 = vadd.f32 %v382_v47, %v375_v60  ;;  %v386_v44 = vadd.f32 %v380_v52, %v373_v29  ;;  %v390_v23 = vadd.f32 %v1968_v1, %v377_v25  ;;  %v432_v1 = vmul.f32 %v428_v58, %v2015_v30 }
 0x155   :  { %v363_v33 = vpop.permute.xlu1 %362  ;;  %v405_v46 = vpop.permute.xlu0 %404  ;;  %v636_v29 = vmul.f32 %v635_v5, %v1936_v50 }
 0x156   :  { %v376_v19 = vadd.f32 %v363_v33, %v339_v28  ;;  %v422_v54 = vadd.f32 %v405_v46, %v385_v37  ;;  %v595_v28 = vmul.f32 %v591_v3, %v1912_v36  ;;  %v433_v36 = vmul.f32 %v428_v58, %v2031_v39 }
 0x158   :  { %v389_v26 = vadd.f32 %v383_v7, %v376_v19  ;;  %v435_v16 = vadd.f32 %v429_v49, %v422_v54  ;;  %v430_v19 = vmul.f32 %v428_v58, %v2023_v34  ;;  %v593_v54 = vmul.f32 %v591_v3, %v1909_v35 }
 0x159   :  { %v411_v17 = vpop.permute.xlu1 %410  ;;  %v612_v22 = vpop.permute.xlu0 %611 }
 0x15a   :  { %v425_v47 = vadd.f32 %v411_v17, %v388_v48  ;;  %v629_v60 = vadd.f32 %v612_v22, %v592_v61  ;;  %v637_v22 = vmul.f32 %v635_v5, %v1947_v56  ;;  %v638_v56 = vmul.f32 %v635_v5, %v1866_v13 }
 0x15c   :  { %v438_v37 = vadd.f32 %v432_v1, %v425_v47  ;;  %v642_v52 = vadd.f32 %v636_v29, %v629_v60  ;;  %v596_v47 = vmul.f32 %v591_v3, %v1920_v42 }
 0x15d   :  { %v618_v63 = vpop.permute.xlu1 %617  ;;  %v407_v25 = vpop.permute.xlu0 %406 }
 0x15e   :  { %v632_v33 = vadd.f32 %v618_v63, %v595_v28  ;;  %v423_v46 = vadd.f32 %v407_v25, %v386_v44  ;;  %v431_v44 = vmul.f32 %v428_v58, %v1878_v18  ;;  %v640_v63 = vmul.f32 %v635_v5, %v1959_v62 }
 0x15f   :  { %v685_v62 = vstv %s1589_s29  ;;  %s1786_s29 = smov 124  }
 0x160   :  { %v645_v48 = vadd.f32 %v639_v31, %v632_v33  ;;  %v436_v7 = vadd.f32 %v430_v19, %v423_v46  ;;  %v434_v33 = vmul.f32 %v428_v58, %v1882_v20 }
 0x161   :  { %v413_v49 = vpop.permute.xlu1 %412  ;;  %v614_v61 = vpop.permute.xlu0 %613 }
 0x162   :  { %v426_v17 = vadd.f32 %v413_v49, %v389_v26  ;;  %v630_v50 = vadd.f32 %v614_v61, %v593_v54  ;;  %v594_v26 = vmul.f32 %v591_v3, %v1922_v43  ;;  %v481_v49 = vmul.f32 %v1984_v9, %v2064_v4 }
 0x164   :  { %v439_v55 = vadd.f32 %v433_v36, %v426_v17  ;;  %v643_v60 = vadd.f32 %v637_v22, %v630_v50  ;;  %v641_v50 = vmul.f32 %v635_v5, %v1870_v15  ;;  %v688_v22 = vmul.f32 %v685_v62, %v1998_v21 }
 0x165   :  { %v620_v1 = vpop.permute.xlu1 %619  ;;  %v409_v29 = vpop.permute.xlu0 %408  ;;  %v686_v21 = vmul.f32 %v685_v62, %v1951_v57 }
 0x166   :  { %v633_v35 = vadd.f32 %v620_v1, %v596_v47  ;;  %v424_v28 = vadd.f32 %v409_v29, %v387_v6  ;;  %v597_v6 = vmul.f32 %v591_v3, %v1916_v41 }
 0x168   :  { %v437_v25 = vadd.f32 %v431_v44, %v424_v28  ;;  %v646_v46 = vadd.f32 %v640_v63, %v633_v35  ;;  %v482_v28 = vmul.f32 %v1984_v9, %v2044_v51 }
 0x169   :  { %v415_v31 = vpop.permute.xlu1 %414  ;;  %v616_v42 = vpop.permute.xlu0 %615 }
 0x16a   :  { %v427_v19 = vadd.f32 %v415_v31, %v390_v23  ;;  %v631_v54 = vadd.f32 %v616_v42, %v594_v26  ;;  %v474_v61 = vadd.f32 %v2114_v0, %v437_v25  ;;  %v479_v23 = vmul.f32 %v1984_v9, %v2035_v40 }
 0x16c   :  { %v440_v17 = vadd.f32 %v434_v33, %v427_v19  ;;  %v644_v43 = vadd.f32 %v638_v56, %v631_v54  ;;  %v2201_v58 = vadd.f32 %v481_v49, %v474_v61  ;;  %v689_v19 = vmul.f32 %v685_v62, %v1970_v2  ;;  %v2788_v54 = vld [vmem:[#allocation19_spill] sm:$0xff] }
 0x16d   :  { %v622_v13 = vpop.permute.xlu1 %621  ;;  %v455_v36 = vpop.permute.xlu0 %454  ;;  %v480_v57 = vmul.f32 %v1984_v9, %v2788_v54 }
 0x16e   :  { %v634_v47 = vadd.f32 %v622_v13, %v597_v6  ;;  %v472_v44 = vadd.f32 %v455_v36, %v435_v16  ;;  %v477_v0 = vadd.f32 %v2120_v11, %v440_v17  ;;  %v681_v41 = vadd.f32 %v2124_v12, %v644_v43  ;;  %v2789_v6 = vld [vmem:[#allocation20_spill] sm:$0xff] }
 0x16f   :  { %v691_v12 = vmul.f32 %v685_v62, %v1953_v59  ;;  %v483_v17 = vmul.f32 %v1984_v9, %v2789_v6  ;;  %v687_v43 = vmul.f32 %v685_v62, %v1980_v8 }
 0x170   :  { %v647_v3 = vadd.f32 %v641_v50, %v634_v47  ;;  %v485_v1 = vadd.f32 %v479_v23, %v472_v44  ;;  %v2209_v29 = vadd.f32 %v1988_v10, %v477_v0  ;;  %v2211_v15 = vadd.f32 %v688_v22, %v681_v41  ;;  %v2790_v47 = vld [vmem:[#allocation21_spill] sm:$0xff] }
 0x171   :  { %v461_v5 = vpop.permute.xlu1 %460  ;;  %v662_v35 = vpop.permute.xlu0 %661  ;;  %v2226_v50 = vstv %s1583_s30  ;;  %v690_v22 = vmul.f32 %v685_v62, %v1992_v14  ;;  %s1616_s30 = sld [smem:[#allocation13 + $0x5]] }
 0x172   :  { %v475_v63 = vadd.f32 %v461_v5, %v438_v37  ;;  %v679_v16 = vadd.f32 %v662_v35, %v642_v52  ;;  %v684_v11 = vadd.f32 %v2130_v24, %v647_v3  ;;  %v529_v44 = vmul.f32 %v2226_v50, %v2790_v47  ;;  %v2791_v5 = vld [vmem:[#allocation22_spill] sm:$0xff] }
 0x173   :  { %v532_v35 = vmul.f32 %v2226_v50, %v2791_v5 }
 0x174   :  { %v488_v26 = vadd.f32 %v482_v28, %v475_v63  ;;  %v692_v25 = vadd.f32 %v686_v21, %v679_v16  ;;  %v2218_v10 = vadd.f32 %v691_v12, %v684_v11  ;;  %v530_v11 = vmul.f32 %v2226_v50, %v2086_v32 }
 0x175   :  { %v668_v33 = vpop.permute.xlu1 %667  ;;  %v457_v56 = vpop.permute.xlu0 %456 }
 0x176   :  { %v682_v31 = vadd.f32 %v668_v33, %v645_v48  ;;  %v473_v42 = vadd.f32 %v457_v56, %v436_v7 }
 0x178   :  { %v695_v37 = vadd.f32 %v689_v19, %v682_v31  ;;  %v486_v52 = vadd.f32 %v480_v57, %v473_v42 }
 0x179   :  { %v463_v24 = vpop.permute.xlu1 %462  ;;  %v664_v49 = vpop.permute.xlu0 %663 }
 0x17a   :  { %v476_v59 = vadd.f32 %v463_v24, %v439_v55  ;;  %v680_v61 = vadd.f32 %v664_v49, %v643_v60  ;;  %v2231_v55 = vstv %s1591_s8  ;;  %s2669_s8 = sld [smem:[#allocation13 + $0x7]] }
 0x17b   :  { %v739_v16 = vmul.f32 %v2231_v55, %v2015_v30  ;;  %v737_v42 = vmul.f32 %v2231_v55, %v2023_v34  ;;  %v740_v49 = vmul.f32 %v2231_v55, %v2031_v39 }
 0x17c   :  { %v489_v48 = vadd.f32 %v483_v17, %v476_v59  ;;  %v693_v7 = vadd.f32 %v687_v43, %v680_v61  ;;  %v534_v61 = vmul.f32 %v2226_v50, %v2105_v53 }
 0x17d   :  { %v670_v2 = vpop.permute.xlu1 %669  ;;  %v505_v13 = vpop.permute.xlu0 %504 }
 0x17e   :  { %v683_v36 = vadd.f32 %v670_v2, %v646_v46  ;;  %v522_v23 = vadd.f32 %v505_v13, %v485_v1  ;;  %v736_v46 = vmul.f32 %v2231_v55, %v2008_v27  ;;  %v533_v27 = vmul.f32 %v2226_v50, %v2092_v38 }
 0x17f   :  { %v2256_v13 = vstv %s148_s9  ;;  %s2674_s9 = sld [smem:[#allocation13 + $0x6]] }
 0x180   :  { %v696_v60 = vadd.f32 %v690_v22, %v683_v36  ;;  %v535_v0 = vadd.f32 %v529_v44, %v522_v23  ;;  %v785_v23 = vstv %s1593_s0  ;;  %s140_s0 = sld [smem:[#allocation13]] }
 0x181   :  { %v511_v9 = vpop.permute.xlu1 %510  ;;  %v712_v41 = vpop.permute.xlu0 %711 }
 0x182   :  { %v525_v8 = vadd.f32 %v511_v9, %v488_v26  ;;  %v729_v3 = vadd.f32 %v712_v41, %v692_v25 }
 0x184   :  { %v538_v1 = vadd.f32 %v532_v35, %v525_v8  ;;  %v742_v28 = vadd.f32 %v736_v46, %v729_v3  ;;  %v789_v46 = vmul.f32 %v785_v23, %v2044_v51  ;;  %v738_v51 = vmul.f32 %v2231_v55, %v1878_v18 }
 0x185   :  { %v718_v14 = vpop.permute.xlu1 %717  ;;  %v507_v62 = vpop.permute.xlu0 %506  ;;  %v790_v18 = vmul.f32 %v785_v23, %v2789_v6 }
 0x186   :  { %v732_v21 = vadd.f32 %v718_v14, %v695_v37  ;;  %v523_v63 = vadd.f32 %v507_v62, %v486_v52 }
 0x188   :  { %v745_v12 = vadd.f32 %v739_v16, %v732_v21  ;;  %v536_v26 = vadd.f32 %v530_v11, %v523_v63  ;;  %v787_v21 = vmul.f32 %v785_v23, %v2788_v54  ;;  %v2275_v11 = vstv %s1597_s2  ;;  %s1615_s2 = sld [smem:[#allocation13 + $0x4]] }
 0x189   :  { %v513_v25 = vpop.permute.xlu1 %512  ;;  %v714_v33 = vpop.permute.xlu0 %713 }
 0x18a   :  { %v526_v56 = vadd.f32 %v513_v25, %v489_v48  ;;  %v730_v31 = vadd.f32 %v714_v33, %v693_v7  ;;  %v2290_v33 = vstv %s1599_s3 }
 0x18c   :  { %v539_v19 = vadd.f32 %v533_v27, %v526_v56  ;;  %v743_v57 = vadd.f32 %v737_v42, %v730_v31  ;;  %v788_v42 = vmul.f32 %v785_v23, %v2064_v4 }
 0x18d   :  { %v720_v37 = vpop.permute.xlu1 %719  ;;  %v509_v52 = vpop.permute.xlu0 %508 }
 0x18e   :  { %v733_v30 = vadd.f32 %v720_v37, %v696_v60  ;;  %v524_v24 = vadd.f32 %v509_v52, %v2201_v58 }
 0x190   :  { %v746_v59 = vadd.f32 %v740_v49, %v733_v30  ;;  %v2297_v30 = vstv %s1607_s5  ;;  %s1788_s5 = smov 122  }
 0x191   :  { %v515_v17 = vpop.permute.xlu1 %514  ;;  %v716_v43 = vpop.permute.xlu0 %715 }
 0x192   :  { %v527_v34 = vadd.f32 %v515_v17, %v2209_v29  ;;  %v2252_v48 = vadd.f32 %v716_v43, %v2211_v15  ;;  %v786_v15 = vmul.f32 %v785_v23, %v2035_v40 }
 0x194   :  { %v2254_v7 = vadd.f32 %v534_v61, %v527_v34  ;;  %v744_v17 = vadd.f32 %v738_v51, %v2252_v48 }
 0x195   :  { %v722_v2 = vpop.permute.xlu1 %721  ;;  %v555_v58 = vpop.permute.xlu0 %554 }
 0x196   :  { %v2259_v39 = vadd.f32 %v722_v2, %v2218_v10  ;;  %v572_v36 = vadd.f32 %v555_v58, %v535_v0  ;;  %v2327_v58 = vstv %s2273_s10 }
 0x198   :  { %v579_v22 = vadd.f32 %v2256_v13, %v572_v36 }
 0x199   :  { %v561_v44 = vpop.permute.xlu1 %560  ;;  %v762_v60 = vpop.permute.xlu0 %761 }
 0x19a   :  { %1636 = vtanh.f32 %v579_v22  ;;  %v575_v29 = vadd.f32 %v561_v44, %v538_v1  ;;  %v779_v9 = vadd.f32 %v762_v60, %v742_v28  ;;  %v531_v28 = vmul.f32 %v2226_v50, %v2096_v45 }
 0x19b   :  { %v2283_v50 = vstv %s1595_s4  ;;  %v2336_v22 = vstv %s2281_s12 }
 0x19c   :  { %v582_v41 = vadd.f32 %v2256_v13, %v575_v29  ;;  %v2264_v8 = vadd.f32 %v786_v15, %v779_v9  ;;  %v836_v49 = vmul.f32 %v2283_v50, %v2790_v47  ;;  %v2306_v4 = vmul.f32 %v2283_v50, %v2791_v5 }
 0x19d   :  { %v768_v10 = vpop.permute.xlu1 %767  ;;  %v557_v3 = vpop.permute.xlu0 %556  ;;  %v2322_v34 = vmul.f32 %v2283_v50, %v2092_v38 }
 0x19e   :  { %1638 = vtanh.f32 %v582_v41  ;;  %v782_v0 = vadd.f32 %v768_v10, %v745_v12  ;;  %v573_v35 = vadd.f32 %v557_v3, %v536_v26  ;;  %v537_v26 = vadd.f32 %v531_v28, %v524_v24 }
 0x19f   :  { %v741_v24 = vmul.f32 %v2231_v55, %v1882_v20  ;;  %v837_v20 = vmul.f32 %v2283_v50, %v2086_v32 }
 0x1a0   :  { %v580_v1 = vadd.f32 %v2256_v13, %v573_v35  ;;  %v2270_v40 = vadd.f32 %v789_v46, %v782_v0 }
 0x1a1   :  { %v563_v14 = vpop.permute.xlu1 %562  ;;  %v764_v62 = vpop.permute.xlu0 %763  ;;  %v747_v32 = vadd.f32 %v741_v24, %v2259_v39 }
 0x1a2   :  { %1640 = vtanh.f32 %v580_v1  ;;  %v576_v63 = vadd.f32 %v563_v14, %v539_v19  ;;  %v780_v16 = vadd.f32 %v764_v62, %v743_v57  ;;  %v2792_v19 = vld [vmem:[#allocation18_spill] sm:$0xff] }
 0x1a3   :  { %v791_v57 = vmul.f32 %v785_v23, %v2792_v19  ;;  %v2331_v23 = vstv %s2277_s11 }
 0x1a4   :  { %v2285_v12 = vpop.eup %1636  ;;  %v583_v54 = vadd.f32 %v2256_v13, %v576_v63  ;;  %v2288_v25 = vadd.f32 %v787_v21, %v780_v16 }
 0x1a5   :  { %v770_v56 = vpop.permute.xlu1 %769  ;;  %v559_v31 = vpop.permute.xlu0 %558  ;;  %v904_v27 = vmul.f32 %v2285_v12, %v2275_v11  ;;  %v961_v6 = vmul.f32 %v2285_v12, %v2290_v33  ;;  %v1174_v2 = vmul.f32 %v2285_v12, %v2297_v30  ;;  %v929_v46 = vmul.f32 %v2285_v12, %v2327_v58 }
 0x1a6   :  { %1642 = vtanh.f32 %v583_v54  ;;  %v783_v37 = vadd.f32 %v770_v56, %v746_v59  ;;  %v574_v52 = vadd.f32 %v559_v31, %v537_v26  ;;  %v1143_v62 = vmul.f32 %v2285_v12, %v2331_v23 }
 0x1a7   :  { %912 = vrot.lane.b32.xlu0 %v904_v27, %s1785_s13  ;;  %v973_v38 = vrot.slane %v961_v6, 2 }
 0x1a8   :  { %v2310_v59 = vpop.eup %1638  ;;  %v581_v61 = vadd.f32 %v2256_v13, %v574_v52  ;;  %v2314_v43 = vadd.f32 %v790_v18, %v783_v37  ;;  %v942_v52 = vrot.slane %v929_v46, 2 }
 0x1a9   :  { %v565_v47 = vpop.permute.xlu1 %564  ;;  %v766_v55 = vpop.permute.xlu0 %765  ;;  %v906_v5 = vmul.f32 %v2310_v59, %v2275_v11  ;;  %v1177_v9 = vmul.f32 %v2310_v59, %v2297_v30  ;;  %v932_v18 = vmul.f32 %v2310_v59, %v2327_v58 }
 0x1aa   :  { %1644 = vtanh.f32 %v581_v61  ;;  %v577_v48 = vadd.f32 %v565_v47, %v2254_v7  ;;  %v781_v36 = vadd.f32 %v766_v55, %v744_v17  ;;  %v964_v7 = vmul.f32 %v2310_v59, %v2290_v33 }
 0x1ab   :  { %916 = vrot.lane.b32.xlu1 %v906_v5, %s1785_s13  ;;  %v1191_v51 = vrot.slane %v1177_v9, 2 }
 0x1ac   :  { %v2338_v44 = vpop.eup %1640  ;;  %v584_v60 = vadd.f32 %v2256_v13, %v577_v48  ;;  %v2341_v29 = vadd.f32 %v788_v42, %v781_v36  ;;  %v1186_v13 = vrot.slane %v1174_v2, 2 }
 0x1ad   :  { %v772_v15 = vpop.permute.xlu1 %771  ;;  %v812_v41 = vpop.permute.xlu0 %811  ;;  %v905_v39 = vmul.f32 %v2338_v44, %v2275_v11  ;;  %v962_v10 = vmul.f32 %v2338_v44, %v2290_v33  ;;  %v1175_v3 = vmul.f32 %v2338_v44, %v2297_v30  ;;  %v2359_v14 = vmul.f32 %v2338_v44, %v2327_v58 }
 0x1ae   :  { %1646 = vtanh.f32 %v584_v60  ;;  %v784_v0 = vadd.f32 %v772_v15, %v747_v32  ;;  %v829_v35 = vadd.f32 %v812_v41, %v2264_v8  ;;  %v978_v8 = vrot.slane %v964_v7, 2 }
 0x1af   :  { %914 = vrot.lane.b32.xlu0 %v905_v39, %s1785_s13  ;;  %v974_v1 = vrot.slane %v962_v10, 2  ;;  %v1187_v28 = vrot.slane %v1175_v3, 2  ;;  %v943_v24 = vrot.slane %v2359_v14, 2  ;;  %v1155_v3 = vrot.slane %v1143_v62, 2 }
 0x1b0   :  { %v2363_v21 = vpop.eup %1642  ;;  %v2365_v63 = vadd.f32 %v791_v57, %v784_v0  ;;  %v842_v16 = vadd.f32 %v836_v49, %v829_v35  ;;  %v2387_v49 = vmul.f32 %v2338_v44, %v2331_v23 }
 0x1b1   :  { %v818_v54 = vpop.permute.xlu1 %817  ;;  %v814_v26 = vpop.permute.xlu0 %813  ;;  %v907_v56 = vmul.f32 %v2363_v21, %v2275_v11  ;;  %v2370_v31 = vsel %vm941_vm3, %v973_v38, %v974_v1  ;;  %v965_v27 = vmul.f32 %v2363_v21, %v2290_v33  ;;  %v2379_v57 = vsel %vm941_vm3, %v1186_v13, %v1187_v28 }
 0x1b2   :  { %v832_v42 = vadd.f32 %v818_v54, %v2270_v40  ;;  %v830_v19 = vadd.f32 %v814_v26, %v2288_v25  ;;  %v1178_v37 = vmul.f32 %v2363_v21, %v2297_v30  ;;  %v933_v17 = vmul.f32 %v2363_v21, %v2327_v58 }
 0x1b3   :  { %918 = vrot.lane.b32.xlu1 %v907_v56, %s1785_s13  ;;  %v979_v11 = vrot.slane %v965_v27, 2  ;;  %v2398_v36 = vsel %vm941_vm3, %v942_v52, %v943_v24  ;;  %v1156_v15 = vrot.slane %v2387_v49, 2 }
 0x1b4   :  { %v1645_v6 = vpop.eup %1644  ;;  %v845_v40 = vadd.f32 %v2306_v4, %v832_v42  ;;  %v843_v25 = vadd.f32 %v837_v20, %v830_v19  ;;  %v1192_v61 = vrot.slane %v1178_v37, 2  ;;  %v947_v20 = vrot.slane %v932_v18, 2 }
 0x1b5   :  { %v820_v47 = vpop.permute.xlu1 %819  ;;  %v816_v55 = vpop.permute.xlu0 %815  ;;  %v2393_v5 = vsel %vm941_vm3, %v978_v8, %v979_v11  ;;  %v963_v2 = vmul.f32 %v1645_v6, %v2290_v33  ;;  %v1176_v48 = vmul.f32 %v1645_v6, %v2297_v30  ;;  %v948_v38 = vrot.slane %v933_v17, 2 }
 0x1b6   :  { %v833_v32 = vadd.f32 %v820_v47, %v2314_v43  ;;  %v2402_v4 = vsel %vm941_vm3, %v1191_v51, %v1192_v61  ;;  %v931_v9 = vmul.f32 %v1645_v6, %v2327_v58  ;;  %v1146_v43 = vmul.f32 %v2310_v59, %v2331_v23 }
 0x1b7   :  { %v976_v60 = vrot.slane %v963_v2, 2  ;;  %v1189_v7 = vrot.slane %v1176_v48, 2  ;;  %v2408_v10 = vsel %vm941_vm3, %v947_v20, %v948_v38  ;;  %v838_v51 = vmul.f32 %v2283_v50, %v2096_v45 }
 0x1b8   :  { %v1647_v41 = vpop.eup %1646  ;;  %v846_v39 = vadd.f32 %v2322_v34, %v833_v32  ;;  %v945_v62 = vrot.slane %v931_v9, 2  ;;  %v2424_v27 = vsel %vm941_vm3, %v1155_v3, %v1156_v15  ;;  %v1160_v19 = vrot.slane %v1146_v43, 2 }
 0x1b9   :  { %v822_v13 = vpop.permute.xlu1 %821  ;;  %v862_v0 = vpop.permute.xlu0 %861  ;;  %v2413_v35 = vsel %vm941_vm3, %v974_v1, %v976_v60  ;;  %v966_v46 = vmul.f32 %v1647_v41, %v2290_v33  ;;  %v2417_v14 = vsel %vm941_vm3, %v1187_v28, %v1189_v7  ;;  %v1179_v8 = vmul.f32 %v1647_v41, %v2297_v30 }
 0x1ba   :  { %v879_v34 = vadd.f32 %v862_v0, %v842_v16  ;;  %v934_v54 = vmul.f32 %v1647_v41, %v2327_v58  ;;  %v1147_v33 = vmul.f32 %v2363_v21, %v2331_v23  ;;  %v831_v1 = vadd.f32 %v816_v55, %v2341_v29 }
 0x1bb   :  { %v981_v26 = vrot.slane %v966_v46, 2  ;;  %v1194_v56 = vrot.slane %v1179_v8, 2  ;;  %v2431_v30 = vsel %vm941_vm3, %v943_v24, %v945_v62  ;;  %v841_v24 = vmul.f32 %v2283_v50, %v2105_v53 }
 0x1bc   :  { %v886_v28 = vadd.f32 %v2336_v22, %v879_v34  ;;  %v950_v16 = vrot.slane %v934_v54, 2  ;;  %v1161_v37 = vrot.slane %v1147_v33, 2  ;;  %v1148_v17 = vmul.f32 %v1647_v41, %v2331_v23 }
 0x1bd   :  { %v868_v45 = vpop.permute.xlu1 %867  ;;  %v864_v18 = vpop.permute.xlu0 %863  ;;  %v2434_v58 = vsel %vm941_vm3, %v979_v11, %v981_v26  ;;  %v2437_v42 = vsel %vm941_vm3, %v1192_v61, %v1194_v56  ;;  %v1145_v61 = vmul.f32 %v1645_v6, %v2331_v23  ;;  %v844_v55 = vadd.f32 %v838_v51, %v831_v1 }
 0x1be   :  { %1648 = vtanh.f32 %v886_v28  ;;  %v882_v52 = vadd.f32 %v868_v45, %v845_v40  ;;  %v880_v49 = vadd.f32 %v864_v18, %v843_v25  ;;  %v2442_v29 = vsel %vm941_vm3, %v948_v38, %v950_v16 }
 0x1bf   :  { %v2449_v11 = vsel %vm941_vm3, %v1160_v19, %v1161_v37  ;;  %v834_v40 = vadd.f32 %v822_v13, %v2365_v63  ;;  %v1158_v50 = vrot.slane %v1145_v61, 2  ;;  %v1163_v48 = vrot.slane %v1148_v17, 2 }
 0x1c0   :  { %v889_v25 = vadd.f32 %v2336_v22, %v882_v52  ;;  %v887_v47 = vadd.f32 %v2336_v22, %v880_v49  ;;  %v1008_v41 = vstv %s2439_s14  ;;  %v1277_v43 = vstv %s1611_s16 }
 0x1c1   :  { %v870_v2 = vpop.permute.xlu1 %869  ;;  %v866_v53 = vpop.permute.xlu0 %865  ;;  %v2457_v23 = vsel %vm941_vm3, %v1156_v15, %v1158_v50  ;;  %v2460_v63 = vsel %vm941_vm3, %v1161_v37, %v1163_v48  ;;  %v847_v60 = vadd.f32 %v841_v24, %v834_v40  ;;  %v2469_v13 = vstv %s1602_s17 }
 0x1c2   :  { %1650 = vtanh.f32 %v889_v25  ;;  %v883_v6 = vadd.f32 %v870_v2, %v846_v39  ;;  %v881_v32 = vadd.f32 %v866_v53, %v844_v55  ;;  %v1064_v39 = vstv %s2446_s15 }
 0x1c3   :  { %1652 = vtanh.f32 %v887_v47  ;;  %v2472_v46 = vstv %s1605_s18  ;;  %v2483_v54 = vstv %s1609_s19  ;;  %v2485_v26 = vstv %s1610_s20 }
 0x1c4   :  { %v890_v20 = vadd.f32 %v2336_v22, %v883_v6  ;;  %v888_v38 = vadd.f32 %v2336_v22, %v881_v32  ;;  %v1120_v1 = vmul.f32 %v2310_v59, %v2472_v46  ;;  %v1119_v45 = vmul.f32 %v2338_v44, %v2472_v46 }
 0x1c5   :  { %v872_v7 = vpop.permute.xlu1 %871 }
 0x1c6   :  { %1654 = vtanh.f32 %v890_v20  ;;  %v884_v9 = vadd.f32 %v872_v7, %v847_v60 }
 0x1c7   :  { %1656 = vtanh.f32 %v888_v38 }
 0x1c8   :  { %v2466_v3 = vpop.eup %1648  ;;  %v891_v15 = vadd.f32 %v2336_v22, %v884_v9  ;;  %v1118_v22 = vmul.f32 %v2285_v12, %v2472_v46 }
 0x1c9   :  { %v1009_v0 = vmul.f32 %v2466_v3, %v1008_v41  ;;  %v1065_v8 = vmul.f32 %v2466_v3, %v1064_v39  ;;  %v1278_v34 = vmul.f32 %v2466_v3, %v1277_v43  ;;  %v1034_v51 = vmul.f32 %v2466_v3, %v2469_v13 }
 0x1ca   :  { %1658 = vtanh.f32 %v891_v15  ;;  %v2503_v61 = vmul.f32 %v2466_v3, %v2485_v26 }
 0x1cb   :  { %1017 = vrot.lane.b32.xlu0 %v1009_v0, %s1785_s13  ;;  %v1077_v19 = vrot.slane %v1065_v8, 2  ;;  %v1290_v49 = vrot.slane %v1278_v34, 2  ;;  %v1046_v24 = vrot.slane %v1034_v51, 2 }
 0x1cc   :  { %v2479_v62 = vpop.eup %1650 }
 0x1cd   :  { %v2487_v56 = vpop.eup %1652  ;;  %v1011_v33 = vmul.f32 %v2479_v62, %v1008_v41  ;;  %v1068_v28 = vmul.f32 %v2479_v62, %v1064_v39  ;;  %v1281_v16 = vmul.f32 %v2479_v62, %v1277_v43  ;;  %v1037_v55 = vmul.f32 %v2479_v62, %v2469_v13 }
 0x1ce   :  { %v1066_v18 = vmul.f32 %v2487_v56, %v1064_v39  ;;  %v1279_v37 = vmul.f32 %v2487_v56, %v1277_v43  ;;  %v1010_v52 = vmul.f32 %v2487_v56, %v1008_v41  ;;  %v1035_v47 = vmul.f32 %v2487_v56, %v2469_v13 }
 0x1cf   :  { %1021 = vrot.lane.b32.xlu1 %v1011_v33, %s1785_s13  ;;  %1126 = vrot.lane.b32.xlu0 %v1118_v22, %s1785_s13  ;;  %v1082_v50 = vrot.slane %v1068_v28, 2  ;;  %v1295_v6 = vrot.slane %v1281_v16, 2  ;;  %v1051_v33 = vrot.slane %v1037_v55, 2 }
 0x1d0   :  { %v2505_v17 = vpop.eup %1654  ;;  %v1078_v40 = vrot.slane %v1066_v18, 2  ;;  %v1291_v25 = vrot.slane %v1279_v37, 2  ;;  %v1047_v0 = vrot.slane %v1035_v47, 2 }
 0x1d1   :  { %v1657_v2 = vpop.eup %1656  ;;  %v1069_v53 = vmul.f32 %v2505_v17, %v1064_v39  ;;  %v1282_v48 = vmul.f32 %v2505_v17, %v1277_v43  ;;  %v1012_v7 = vmul.f32 %v2505_v17, %v1008_v41  ;;  %v1038_v22 = vmul.f32 %v2505_v17, %v2469_v13 }
 0x1d2   :  { %v2514_v32 = vsel %vm941_vm3, %v1077_v19, %v1078_v40  ;;  %v1067_v20 = vmul.f32 %v1657_v2, %v1064_v39  ;;  %v2517_v38 = vsel %vm941_vm3, %v1290_v49, %v1291_v25  ;;  %v1280_v60 = vmul.f32 %v1657_v2, %v1277_v43 }
 0x1d3   :  { %1130 = vrot.lane.b32.xlu1 %v1120_v1, %s1785_s13  ;;  %1019 = vrot.lane.b32.xlu0 %v1010_v52, %s1785_s13  ;;  %v1083_v9 = vrot.slane %v1069_v53, 2  ;;  %v1296_v15 = vrot.slane %v1282_v48, 2  ;;  %v2529_v37 = vsel %vm941_vm3, %v1046_v24, %v1047_v0  ;;  %v1052_v52 = vrot.slane %v1038_v22, 2 }
 0x1d4   :  { %v1659_v8 = vpop.eup %1658  ;;  %v1080_v34 = vrot.slane %v1067_v20, 2  ;;  %v1293_v51 = vrot.slane %v1280_v60, 2  ;;  %v1036_v55 = vmul.f32 %v1657_v2, %v2469_v13  ;;  %v1251_v20 = vmul.f32 %v2505_v17, %v2485_v26 }
 0x1d5   :  { %v1084_v28 = vsel %vm941_vm3, %v1082_v50, %v1083_v9  ;;  %v1070_v16 = vmul.f32 %v1659_v8, %v1064_v39  ;;  %v1297_v18 = vsel %vm941_vm3, %v1295_v6, %v1296_v15  ;;  %v1283_v1 = vmul.f32 %v1659_v8, %v1277_v43 }
 0x1d6   :  { %v1081_v19 = vsel %vm941_vm3, %v1078_v40, %v1080_v34  ;;  %v1294_v41 = vsel %vm941_vm3, %v1291_v25, %v1293_v51  ;;  %v1121_v39 = vmul.f32 %v2363_v21, %v2472_v46  ;;  %v1222_v43 = vmul.f32 %v2466_v3, %v2483_v54 }
 0x1d7   :  { %1023 = vrot.lane.b32.xlu1 %v1012_v7, %s1785_s13  ;;  %1128 = vrot.lane.b32.xlu0 %v1119_v45, %s1785_s13  ;;  %v1085_v49 = vrot.slane %v1070_v16, 2  ;;  %v1298_v47 = vrot.slane %v1283_v1, 2  ;;  %v2539_v40 = vsel %vm941_vm3, %v1051_v33, %v1052_v52  ;;  %v1039_v24 = vmul.f32 %v1659_v8, %v2469_v13 }
 0x1d8   :  { %v1049_v45 = vrot.slane %v1036_v55, 2  ;;  %v1248_v50 = vmul.f32 %v2487_v56, %v2485_v26  ;;  %v1259_v6 = vrot.slane %v2503_v61, 2  ;;  %v1250_v46 = vmul.f32 %v2479_v62, %v2485_v26 }
 0x1d9   :  { %v1086_v25 = vsel %vm941_vm3, %v1083_v9, %v1085_v49  ;;  %v1299_v53 = vsel %vm941_vm3, %v1296_v15, %v1298_v47  ;;  %v1054_v48 = vrot.slane %v1039_v24, 2  ;;  %v1249_v7 = vmul.f32 %v1657_v2, %v2485_v26 }
 0x1da   :  { %v2554_v13 = vsel %vm941_vm3, %v1047_v0, %v1049_v45  ;;  %v1260_v60 = vrot.slane %v1248_v50, 2  ;;  %v1252_v9 = vmul.f32 %v1659_v8, %v2485_v26  ;;  %v1224_v61 = vmul.f32 %v2479_v62, %v2483_v54 }
 0x1db   :  { %1132 = vrot.lane.b32.xlu1 %v1121_v39, %s1785_s13  ;;  %1230 = vrot.lane.b32.xlu0 %v1222_v43, %s1785_s13  ;;  %v2561_v15 = vsel %vm941_vm3, %v1052_v52, %v1054_v48  ;;  %v1264_v34 = vrot.slane %v1250_v46, 2  ;;  %v1265_v51 = vrot.slane %v1251_v20, 2  ;;  %v1223_v22 = vmul.f32 %v2487_v56, %v2483_v54 }
 0x1dc   :  { %v2566_v33 = vsel %vm941_vm3, %v1259_v6, %v1260_v60  ;;  %v1262_v0 = vrot.slane %v1249_v7, 2  ;;  %v1267_v16 = vrot.slane %v1252_v9, 2  ;;  %v1225_v1 = vmul.f32 %v2505_v17, %v2483_v54 }
 0x1dd   :  { %v2569_v2 = vsel %vm941_vm3, %v1264_v34, %v1265_v51  ;;  %v1112_v55 = vstv %s1604_s1 }
 0x1de   :  { %v2574_v26 = vsel %vm941_vm3, %v1260_v60, %v1262_v0  ;;  %v2577_v8 = vsel %vm941_vm3, %v1265_v51, %v1267_v16 }
 0x1df   :  { %1234 = vrot.lane.b32.xlu1 %v1224_v61, %s1785_s13  ;;  %1232 = vrot.lane.b32.xlu0 %v1223_v22, %s1785_s13 }
 0x1e3   :  { %1236 = vrot.lane.b32.xlu1 %v1225_v1, %s1785_s13  ;;  %983 = vrot.lane.b32.xlu0 %v2370_v31, %s1785_s13  ;;  %v898_v31 = vstv %s124_s21 }
 0x1e4   :  { %v900_v54 = vmul.f32 %v2338_v44, %v898_v31 }
 0x1e7   :  { %987 = vrot.lane.b32.xlu1 %v2393_v5, %s1785_s13  ;;  %985 = vrot.lane.b32.xlu0 %v2413_v35, %s1785_s13  ;;  %v901_v35 = vmul.f32 %v2310_v59, %v898_v31 }
 0x1eb   :  { %989 = vrot.lane.b32.xlu1 %v2434_v58, %s1785_s13  ;;  %1087 = vrot.lane.b32.xlu0 %v2514_v32, %s1785_s13 }
 0x1ef   :  { %1091 = vrot.lane.b32.xlu1 %v1084_v28, %s1785_s13  ;;  %1196 = vrot.lane.b32.xlu0 %v2379_v57, %s1785_s13  ;;  %v899_v57 = vmul.f32 %v2285_v12, %v898_v31 }
 0x1f3   :  { %1200 = vrot.lane.b32.xlu1 %v2402_v4, %s1785_s13  ;;  %1089 = vrot.lane.b32.xlu0 %v1081_v19, %s1785_s13 }
 0x1f7   :  { %1093 = vrot.lane.b32.xlu1 %v1086_v25, %s1785_s13  ;;  %1198 = vrot.lane.b32.xlu0 %v2417_v14, %s1785_s13 }
 0x1fb   :  { %1202 = vrot.lane.b32.xlu1 %v2437_v42, %s1785_s13  ;;  %1300 = vrot.lane.b32.xlu0 %v2517_v38, %s1785_s13 }
 0x1ff   :  { %1304 = vrot.lane.b32.xlu1 %v1297_v18, %s1785_s13  ;;  %1302 = vrot.lane.b32.xlu0 %v1294_v41, %s1785_s13  ;;  %v902_v18 = vmul.f32 %v2363_v21, %v898_v31 }
 0x203   :  { %1306 = vrot.lane.b32.xlu1 %v1299_v53, %s1785_s13 }
 0x219   :  { %v913_v5 = vpop.permute.xlu0 %912 }
 0x21a   :  { %v924_v4 = vadd.f32 %v913_v5, %v899_v57 }
 0x21c   :  { %v956_v14 = vadd.f32 %v2398_v36, %v924_v4  ;;  %v1113_v36 = vmul.f32 %v2285_v12, %v1112_v55  ;;  %v1116_v12 = vmul.f32 %v2363_v21, %v1112_v55 }
 0x21d   :  { %v917_v58 = vpop.permute.xlu1 %916 }
 0x21e   :  { %v926_v42 = vadd.f32 %v917_v58, %v901_v35 }
 0x220   :  { %v958_v32 = vadd.f32 %v2408_v10, %v926_v42  ;;  %v1115_v10 = vmul.f32 %v2310_v59, %v1112_v55 }
 0x221   :  { %v915_v38 = vpop.permute.xlu0 %914 }
 0x222   :  { %v925_v28 = vadd.f32 %v915_v38, %v900_v54  ;;  %v1103_v54 = vstv %s150_s23 }
 0x224   :  { %v957_v19 = vadd.f32 %v2431_v30, %v925_v28  ;;  %v1114_v30 = vmul.f32 %v2338_v44, %v1112_v55 }
 0x225   :  { %v919_v41 = vpop.permute.xlu1 %918 }
 0x226   :  { %v927_v52 = vadd.f32 %v919_v41, %v902_v18 }
 0x228   :  { %v959_v49 = vadd.f32 %v2442_v29, %v927_v52 }
 0x23d   :  { %v1018_v47 = vpop.permute.xlu0 %1017 }
 0x241   :  { %v1022_v39 = vpop.permute.xlu1 %1021  ;;  %v1127_v43 = vpop.permute.xlu0 %1126 }
 0x242   :  { %v1138_v24 = vadd.f32 %v1127_v43, %v1113_v36 }
 0x244   :  { %v1169_v25 = vadd.f32 %v2424_v27, %v1138_v24 }
 0x245   :  { %v1131_v53 = vpop.permute.xlu1 %1130  ;;  %v1020_v45 = vpop.permute.xlu0 %1019 }
 0x246   :  { %v1140_v50 = vadd.f32 %v1131_v53, %v1115_v10 }
 0x248   :  { %v1171_v48 = vadd.f32 %v2449_v11, %v1140_v50  ;;  %v999_v11 = vstv %s1600_s22 }
 0x249   :  { %v1024_v29 = vpop.permute.xlu1 %1023  ;;  %v1129_v6 = vpop.permute.xlu0 %1128  ;;  %v1000_v21 = vmul.f32 %v2466_v3, %v999_v11  ;;  %v1002_v22 = vmul.f32 %v2479_v62, %v999_v11  ;;  %v1001_v1 = vmul.f32 %v2487_v56, %v999_v11  ;;  %v1003_v58 = vmul.f32 %v2505_v17, %v999_v11 }
 0x24a   :  { %v1139_v46 = vadd.f32 %v1129_v6, %v1114_v30  ;;  %v1330_v11 = vstv %s1612_s25 }
 0x24c   :  { %v2623_v20 = vadd.f32 %v2457_v23, %v1139_v46 }
 0x24d   :  { %v1133_v60 = vpop.permute.xlu1 %1132  ;;  %v1231_v59 = vpop.permute.xlu0 %1230 }
 0x24e   :  { %v1141_v7 = vadd.f32 %v1133_v60, %v1116_v12 }
 0x250   :  { %v2626_v27 = vadd.f32 %v2460_v63, %v1141_v7 }
 0x251   :  { %v2628_v9 = vpop.permute.xlu1 %1234  ;;  %v2630_v44 = vpop.permute.xlu0 %1232 }
 0x255   :  { %v2632_v61 = vpop.permute.xlu1 %1236  ;;  %v984_v34 = vpop.permute.xlu0 %983 }
 0x256   :  { %v995_v23 = vadd.f32 %v984_v34, %v956_v14  ;;  %v1212_v14 = vstv %s1608_s24 }
 0x257   :  { %v1213_v43 = vmul.f32 %v2466_v3, %v1212_v14 }
 0x258   :  { %v1004_v51 = vadd.f32 %v1000_v21, %v995_v23 }
 0x259   :  { %v988_v0 = vpop.permute.xlu1 %987  ;;  %v986_v16 = vpop.permute.xlu0 %985 }
 0x25a   :  { %v997_v63 = vadd.f32 %v988_v0, %v958_v32  ;;  %v996_v31 = vadd.f32 %v986_v16, %v957_v19  ;;  %v1029_v57 = vadd.f32 %v1018_v47, %v1004_v51  ;;  %v1379_v16 = vstv %s1614_s27 }
 0x25c   :  { %v1006_v5 = vadd.f32 %v1002_v22, %v997_v63  ;;  %v1005_v4 = vadd.f32 %v1001_v1, %v996_v31  ;;  %v1060_v35 = vadd.f32 %v2529_v37, %v1029_v57  ;;  %v1316_v22 = vstv %s1620_s26 }
 0x25d   :  { %v990_v42 = vpop.permute.xlu1 %989  ;;  %v1088_v38 = vpop.permute.xlu0 %1087 }
 0x25e   :  { %v998_v28 = vadd.f32 %v990_v42, %v959_v49  ;;  %v1099_v18 = vadd.f32 %v1088_v38, %v1060_v35  ;;  %v1031_v41 = vadd.f32 %v1022_v39, %v1006_v5  ;;  %v1030_v52 = vadd.f32 %v1020_v45, %v1005_v4 }
 0x25f   :  { %v1215_v45 = vmul.f32 %v2479_v62, %v1212_v14 }
 0x260   :  { %v1007_v55 = vadd.f32 %v1003_v58, %v998_v28  ;;  %v1104_v32 = vadd.f32 %v1103_v54, %v1099_v18  ;;  %v1062_v36 = vadd.f32 %v2539_v40, %v1031_v41  ;;  %v1061_v19 = vadd.f32 %v2554_v13, %v1030_v52 }
 0x261   :  { %v1092_v47 = vpop.permute.xlu1 %1091  ;;  %v1197_v37 = vpop.permute.xlu0 %1196  ;;  %v1355_v58 = vstv %s1613_s28 }
 0x262   :  { %1660 = vtanh.f32 %v1104_v32  ;;  %v1101_v24 = vadd.f32 %v1092_v47, %v1062_v36  ;;  %v1208_v10 = vadd.f32 %v1197_v37, %v1169_v25  ;;  %v1032_v53 = vadd.f32 %v1024_v29, %v1007_v55 }
 0x263   :  { %v1214_v29 = vmul.f32 %v2487_v56, %v1212_v14 }
 0x264   :  { %v1106_v50 = vadd.f32 %v1103_v54, %v1101_v24  ;;  %v1217_v49 = vadd.f32 %v1213_v43, %v1208_v10  ;;  %v1063_v39 = vadd.f32 %v2561_v15, %v1032_v53 }
 0x265   :  { %v1201_v30 = vpop.permute.xlu1 %1200  ;;  %v1090_v6 = vpop.permute.xlu0 %1089 }
 0x266   :  { %1662 = vtanh.f32 %v1106_v50  ;;  %v1210_v40 = vadd.f32 %v1201_v30, %v1171_v48  ;;  %v1100_v13 = vadd.f32 %v1090_v6, %v1061_v19  ;;  %v1242_v3 = vadd.f32 %v1231_v59, %v1217_v49 }
 0x267   :  { %v1419_v49 = vstv %s1616_s30 }
 0x268   :  { %v1219_v46 = vadd.f32 %v1215_v45, %v1210_v40  ;;  %v1105_v12 = vadd.f32 %v1103_v54, %v1100_v13  ;;  %v1273_v60 = vadd.f32 %v2566_v33, %v1242_v3  ;;  %v1216_v33 = vmul.f32 %v2505_v17, %v1212_v14 }
 0x269   :  { %v1094_v25 = vpop.permute.xlu1 %1093  ;;  %v1199_v7 = vpop.permute.xlu0 %1198 }
 0x26a   :  { %1664 = vtanh.f32 %v1105_v12  ;;  %v1102_v62 = vadd.f32 %v1094_v25, %v1063_v39  ;;  %v1209_v15 = vadd.f32 %v1199_v7, %v2623_v20  ;;  %v1244_v34 = vadd.f32 %v2628_v9, %v1219_v46 }
 0x26b   :  { %v1444_v25 = vstv %s2674_s9 }
 0x26c   :  { %v2648_v21 = vpop.eup %1660  ;;  %v1107_v48 = vadd.f32 %v1103_v54, %v1102_v62  ;;  %v1218_v59 = vadd.f32 %v1214_v29, %v1209_v15  ;;  %v1275_v23 = vadd.f32 %v2569_v2, %v1244_v34 }
 0x26d   :  { %v1203_v51 = vpop.permute.xlu1 %1202  ;;  %v1301_v56 = vpop.permute.xlu0 %1300  ;;  %v1331_v0 = vmul.f32 %v2648_v21, %v1330_v11  ;;  %v1380_v35 = vmul.f32 %v2648_v21, %v1379_v16  ;;  %v1356_v28 = vmul.f32 %v2648_v21, %v1355_v58 }
 0x26e   :  { %1666 = vtanh.f32 %v1107_v48  ;;  %v1211_v63 = vadd.f32 %v1203_v51, %v2626_v27  ;;  %v1312_v20 = vadd.f32 %v1301_v56, %v1273_v60  ;;  %v1243_v9 = vadd.f32 %v2630_v44, %v1218_v59 }
 0x26f   :  { %1339 = vrot.lane.b32.xlu0 %v1331_v0, %s1786_s29  ;;  %v1388_v32 = vrot.slane %v1380_v35, 4  ;;  %v1365_v37 = vrot.slane %v1356_v28, 4  ;;  %v1467_v60 = vstv %s2669_s8 }
 0x270   :  { %v2656_v1 = vpop.eup %1662  ;;  %v1220_v2 = vadd.f32 %v1216_v33, %v1211_v63  ;;  %v1317_v31 = vadd.f32 %v1316_v22, %v1312_v20  ;;  %v1274_v17 = vadd.f32 %v2574_v26, %v1243_v9 }
 0x271   :  { %v1305_v57 = vpop.permute.xlu1 %1304  ;;  %v1303_v5 = vpop.permute.xlu0 %1302  ;;  %v1333_v4 = vmul.f32 %v2656_v1, %v1330_v11  ;;  %v1382_v36 = vmul.f32 %v2656_v1, %v1379_v16  ;;  %v1358_v24 = vmul.f32 %v2656_v1, %v1355_v58 }
 0x272   :  { %1668 = vtanh.f32 %v1317_v31  ;;  %v1314_v27 = vadd.f32 %v1305_v57, %v1275_v23  ;;  %v1313_v42 = vadd.f32 %v1303_v5, %v1274_v17  ;;  %v1245_v44 = vadd.f32 %v2632_v61, %v1220_v2 }
 0x273   :  { %1343 = vrot.lane.b32.xlu1 %v1333_v4, %s1786_s29  ;;  %v1391_v6 = vrot.slane %v1382_v36, 4  ;;  %v1368_v3 = vrot.slane %v1358_v24, 4 }
 0x274   :  { %v2663_v54 = vpop.eup %1664  ;;  %v1319_v38 = vadd.f32 %v1316_v22, %v1314_v27  ;;  %v1318_v14 = vadd.f32 %v1316_v22, %v1313_v42  ;;  %v1276_v26 = vadd.f32 %v2577_v8, %v1245_v44  ;;  %v1325_v42 = vstv %s140_s0 }
 0x275   :  { %v1307_v18 = vpop.permute.xlu1 %1306  ;;  %v1332_v41 = vmul.f32 %v2663_v54, %v1330_v11  ;;  %v1381_v52 = vmul.f32 %v2663_v54, %v1379_v16  ;;  %v2672_v61 = vmul.f32 %v2663_v54, %v1355_v58  ;;  %v1326_v44 = vmul.f32 %v2648_v21, %v1325_v42 }
 0x276   :  { %1670 = vtanh.f32 %v1319_v38  ;;  %v1315_v55 = vadd.f32 %v1307_v18, %v1276_v26  ;;  %v1328_v26 = vmul.f32 %v2656_v1, %v1325_v42  ;;  %v1410_v1 = vstv %s1615_s2 }
 0x277   :  { %1672 = vtanh.f32 %v1318_v14  ;;  %1341 = vrot.lane.b32.xlu0 %v1332_v41, %s1786_s29  ;;  %v1389_v8 = vrot.slane %v1381_v52, 4  ;;  %v1366_v19 = vrot.slane %v2672_v61, 4 }
 0x278   :  { %v2679_v47 = vpop.eup %1666  ;;  %v1320_v43 = vadd.f32 %v1316_v22, %v1315_v55 }
 0x279   :  { %v1334_v10 = vmul.f32 %v2679_v47, %v1330_v11  ;;  %v1383_v53 = vmul.f32 %v2679_v47, %v1379_v16  ;;  %v1390_v50 = vsel %vm1364_vm4, %v1388_v32, %v1389_v8  ;;  %v2686_v39 = vmul.f32 %v2679_v47, %v1355_v58 }
 0x27a   :  { %1674 = vtanh.f32 %v1320_v43  ;;  %v1367_v45 = vsel %vm1364_vm4, %v1365_v37, %v1366_v19  ;;  %v1327_v32 = vmul.f32 %v2663_v54, %v1325_v42  ;;  %v1329_v37 = vmul.f32 %v2679_v47, %v1325_v42 }
 0x27b   :  { %1345 = vrot.lane.b32.xlu1 %v1334_v10, %s1786_s29  ;;  %v1392_v30 = vrot.slane %v1383_v53, 4  ;;  %v1369_v13 = vrot.slane %v2686_v39, 4 }
 0x27c   :  { %v2692_v40 = vpop.eup %1668 }
 0x27d   :  { %v1420_v46 = vmul.f32 %v2692_v40, %v1419_v49  ;;  %v1393_v12 = vsel %vm1364_vm4, %v1391_v6, %v1392_v30  ;;  %v1370_v29 = vsel %vm1364_vm4, %v1368_v3, %v1369_v13  ;;  %v1468_v11 = vmul.f32 %v2692_v40, %v1467_v60 }
 0x27e   :  { %v1445_v62 = vmul.f32 %v2692_v40, %v1444_v25 }
 0x27f   :  { %1428 = vrot.lane.b32.xlu0 %v1420_v46, %s1786_s29  ;;  %v1476_v22 = vrot.slane %v1468_v11, 4  ;;  %v1411_v46 = vmul.f32 %v2692_v40, %v1410_v1  ;;  %v1498_v40 = vstv %s2772_s6  ;;  %s1787_s6 = smov 125  }
 0x280   :  { %v2703_v7 = vpop.eup %1670  ;;  %v1453_v0 = vrot.slane %v1445_v62, 4 }
 0x281   :  { %v1673_v15 = vpop.eup %1672  ;;  %v1422_v34 = vmul.f32 %v2703_v7, %v1419_v49  ;;  %v1470_v23 = vmul.f32 %v2703_v7, %v1467_v60  ;;  %v1447_v33 = vmul.f32 %v2703_v7, %v1444_v25 }
 0x282   :  { %v1469_v48 = vmul.f32 %v1673_v15, %v1467_v60  ;;  %v2708_v59 = vmul.f32 %v1673_v15, %v1444_v25  ;;  %v1421_v4 = vmul.f32 %v1673_v15, %v1419_v49 }
 0x283   :  { %1432 = vrot.lane.b32.xlu1 %v1422_v34, %s1786_s29  ;;  %1396 = vrot.lane.b32.xlu0 %v1389_v8, %s1786_s29  ;;  %v1479_v31 = vrot.slane %v1470_v23, 4  ;;  %v1456_v57 = vrot.slane %v1447_v33, 4 }
 0x284   :  { %v1675_v51 = vpop.eup %1674  ;;  %v1477_v56 = vrot.slane %v1469_v48, 4  ;;  %v1454_v16 = vrot.slane %v2708_v59, 4 }
 0x285   :  { %v1471_v63 = vmul.f32 %v1675_v51, %v1467_v60  ;;  %v2715_v20 = vmul.f32 %v1675_v51, %v1444_v25  ;;  %v1423_v27 = vmul.f32 %v1675_v51, %v1419_v49  ;;  %v1412_v49 = vmul.f32 %v1673_v15, %v1410_v1 }
 0x286   :  { %v1478_v9 = vsel %vm1364_vm4, %v1476_v22, %v1477_v56  ;;  %v1455_v2 = vsel %vm1364_vm4, %v1453_v0, %v1454_v16  ;;  %v1414_v47 = vmul.f32 %v1675_v51, %v1410_v1 }
 0x287   :  { %1400 = vrot.lane.b32.xlu1 %v1392_v30, %s1786_s29  ;;  %1394 = vrot.lane.b32.xlu0 %v1390_v50, %s1786_s29  ;;  %v1480_v17 = vrot.slane %v1471_v63, 4  ;;  %v1457_v5 = vrot.slane %v2715_v20, 4 }
 0x289   :  { %v1481_v35 = vsel %vm1364_vm4, %v1479_v31, %v1480_v17  ;;  %v1458_v58 = vsel %vm1364_vm4, %v1456_v57, %v1457_v5 }
 0x28b   :  { %1398 = vrot.lane.b32.xlu1 %v1393_v12, %s1786_s29  ;;  %1430 = vrot.lane.b32.xlu0 %v1421_v4, %s1786_s29 }
 0x28f   :  { %1434 = vrot.lane.b32.xlu1 %v1423_v27, %s1786_s29  ;;  %1482 = vrot.lane.b32.xlu0 %v1478_v9, %s1786_s29 }
 0x293   :  { %1486 = vrot.lane.b32.xlu1 %v1481_v35, %s1786_s29  ;;  %1484 = vrot.lane.b32.xlu0 %v1477_v56, %s1786_s29 }
 0x297   :  { %1488 = vrot.lane.b32.xlu1 %v1480_v17, %s1786_s29 }
 0x2e1   :  { %v1340_v38 = vpop.permute.xlu0 %1339 }
 0x2e2   :  { %v1351_v14 = vadd.f32 %v1340_v38, %v1326_v44 }
 0x2e4   :  { %v1375_v28 = vadd.f32 %v1367_v45, %v1351_v14 }
 0x2e5   :  { %v1344_v18 = vpop.permute.xlu1 %1343 }
 0x2e6   :  { %v1353_v41 = vadd.f32 %v1344_v18, %v1328_v26 }
 0x2e8   :  { %v1377_v52 = vadd.f32 %v1370_v29, %v1353_v41  ;;  %v1413_v29 = vmul.f32 %v2703_v7, %v1410_v1 }
 0x2e9   :  { %v1342_v55 = vpop.permute.xlu0 %1341 }
 0x2ea   :  { %v1352_v8 = vadd.f32 %v1342_v55, %v1327_v32 }
 0x2ec   :  { %v1376_v21 = vadd.f32 %v1366_v19, %v1352_v8 }
 0x2ed   :  { %v1346_v36 = vpop.permute.xlu1 %1345 }
 0x2ee   :  { %v1354_v24 = vadd.f32 %v1346_v36, %v1329_v37 }
 0x2f0   :  { %v1378_v45 = vadd.f32 %v1369_v13, %v1354_v24 }
 0x2f1   :  { %v1429_v43 = vpop.permute.xlu0 %1428 }
 0x2f5   :  { %v1433_v10 = vpop.permute.xlu1 %1432  ;;  %v1397_v53 = vpop.permute.xlu0 %1396 }
 0x2f6   :  { %v1407_v50 = vadd.f32 %v1397_v53, %v1376_v21 }
 0x2f8   :  { %v1416_v30 = vadd.f32 %v1412_v49, %v1407_v50 }
 0x2f9   :  { %v1401_v6 = vpop.permute.xlu1 %1400  ;;  %v1395_v54 = vpop.permute.xlu0 %1394 }
 0x2fa   :  { %v1409_v3 = vadd.f32 %v1401_v6, %v1378_v45  ;;  %v1406_v12 = vadd.f32 %v1395_v54, %v1375_v28 }
 0x2fc   :  { %v1415_v60 = vadd.f32 %v1411_v46, %v1406_v12  ;;  %v1418_v25 = vadd.f32 %v1414_v47, %v1409_v3 }
 0x2fd   :  { %v1399_v61 = vpop.permute.xlu1 %1398  ;;  %v1431_v19 = vpop.permute.xlu0 %1430 }
 0x2fe   :  { %v1408_v11 = vadd.f32 %v1399_v61, %v1377_v52  ;;  %v1441_v62 = vadd.f32 %v1431_v19, %v1416_v30  ;;  %v1440_v15 = vadd.f32 %v1429_v43, %v1415_v60 }
 0x300   :  { %v1417_v34 = vadd.f32 %v1413_v29, %v1408_v11  ;;  %v1463_v39 = vadd.f32 %v1455_v2, %v1440_v15  ;;  %v1464_v13 = vadd.f32 %v1454_v16, %v1441_v62 }
 0x301   :  { %v1435_v48 = vpop.permute.xlu1 %1434  ;;  %v1483_v23 = vpop.permute.xlu0 %1482 }
 0x302   :  { %v1443_v33 = vadd.f32 %v1435_v48, %v1418_v25  ;;  %v1494_v51 = vadd.f32 %v1483_v23, %v1463_v39  ;;  %v1442_v22 = vadd.f32 %v1433_v10, %v1417_v34 }
 0x304   :  { %v1499_v56 = vadd.f32 %v1498_v40, %v1494_v51  ;;  %v1465_v0 = vadd.f32 %v1458_v58, %v1442_v22  ;;  %v1466_v7 = vadd.f32 %v1457_v5, %v1443_v33 }
 0x305   :  { %v1487_v63 = vpop.permute.xlu1 %1486  ;;  %v1485_v9 = vpop.permute.xlu0 %1484 }
 0x306   :  { %1676 = vtanh.f32 %v1499_v56  ;;  %v1496_v2 = vadd.f32 %v1487_v63, %v1465_v0  ;;  %v1495_v59 = vadd.f32 %v1485_v9, %v1464_v13 }
 0x308   :  { %v1501_v16 = vadd.f32 %v1498_v40, %v1496_v2  ;;  %v1500_v31 = vadd.f32 %v1498_v40, %v1495_v59 }
 0x309   :  { %v1489_v17 = vpop.permute.xlu1 %1488 }
 0x30a   :  { %1678 = vtanh.f32 %v1501_v16  ;;  %v1497_v57 = vadd.f32 %v1489_v17, %v1466_v7 }
 0x30b   :  { %1680 = vtanh.f32 %v1500_v31 }
 0x30c   :  { %v1502_v4 = vadd.f32 %v1498_v40, %v1497_v57 }
 0x30e   :  { %1682 = vtanh.f32 %v1502_v4 }
 0x310   :  { %v1677_v35 = vpop.eup %1676 }
 0x311   :  { %1511 = vrot.lane.b32.xlu0 %v1677_v35, %s1787_s6 }
 0x314   :  { %v1679_v58 = vpop.eup %1678 }
 0x315   :  { %v1681_v27 = vpop.eup %1680  ;;  %1515 = vrot.lane.b32.xlu1 %v1679_v58, %s1787_s6 }
 0x316   :  { %1513 = vrot.lane.b32.xlu0 %v1681_v27, %s1787_s6 }
 0x318   :  { %v1683_v20 = vpop.eup %1682 }
 0x319   :  { %1517 = vrot.lane.b32.xlu1 %v1683_v20, %s1787_s6 }
 0x31a   :  { %1523 = vrot.lane.b32.xlu0 %v1677_v35, %s1788_s5 }
 0x31d   :  { %1527 = vrot.lane.b32.xlu1 %v1679_v58, %s1788_s5 }
 0x31e   :  { %1525 = vrot.lane.b32.xlu0 %v1681_v27, %s1788_s5 }
 0x321   :  { %1529 = vrot.lane.b32.xlu1 %v1683_v20, %s1788_s5 }
 0x383   :  { %v1512_v5 = vpop.permute.xlu0 %1511 }
 0x384   :  { %v1536_v14 = vsel %vm1535_vm5, %v1677_v35, %v1512_v5 }
 0x387   :  { %v1516_v42 = vpop.permute.xlu1 %1515 }
 0x388   :  { %v1514_v44 = vpop.permute.xlu0 %1513  ;;  %v1538_v18 = vsel %vm1535_vm5, %v1679_v58, %v1516_v42 }
 0x389   :  { %v1537_v55 = vsel %vm1535_vm5, %v1681_v27, %v1514_v44 }
 0x38b   :  { %v1518_v38 = vpop.permute.xlu1 %1517 }
 0x38c   :  { %v1524_v26 = vpop.permute.xlu0 %1523  ;;  %v1539_v24 = vsel %vm1535_vm5, %v1683_v20, %v1518_v38 }
 0x38d   :  { %v1541_v28 = vsel %vm1540_vm6, %v1536_v14, %v1524_v26 }
 0x38e   :  { %v1547_v41 = vrot.slane %v1541_v28, 3 }
 0x38f   :  { %v1528_v52 = vpop.permute.xlu1 %1527 }
 0x390   :  { %v1543_v32 = vsel %vm1540_vm6, %v1538_v18, %v1528_v52  ;;  %v1526_v8 = vpop.permute.xlu0 %1525  ;;  %v1558_v21 = vsel %vm1557_vm7, %v1541_v28, %v1547_v41 }
 0x391   :  { %v1542_v36 = vsel %vm1540_vm6, %v1537_v55, %v1526_v8  ;;  %v1548_v43 = vrot.slane %v1543_v32, 3 }
 0x392   :  { %v1553_v37 = vrot.slane %v1542_v36, 6 }
 0x393   :  { %v1530_v10 = vpop.permute.xlu1 %1529  ;;  %v1559_v49 = vsel %vm1557_vm7, %v1543_v32, %v1548_v43 }
 0x394   :  { %v1561_v53 = vsel %vm1560_vm8, %v1558_v21, %v1553_v37  ;;  %v1544_v1 = vsel %vm1540_vm6, %v1539_v24, %v1530_v10 }
 0x395   :  { %1564 = vst.msk [vmem:[%s2773_s7] sm:$0x7] %vm1563_vm9, %v1561_v53  ;;  %v1554_v50 = vrot.slane %v1544_v1, 6 }
 0x397   :  { %v1562_v45 = vsel %vm1560_vm8, %v1559_v49, %v1554_v50 }
 0x398   :  { %1565 = vst.msk [vmem:[%s2773_s7 + $0x4] sm:$0x7] %vm1563_vm9, %v1562_v45 }
 0x399   :  { %1570 = vsyncpa [#allocation5], 1 }
 0x39a   :  { %1571 = vsyncpa [#allocation6], 1 }
 0x39b   :  { %1572 = vsyncpa [#allocation9], 1 }
 0x39c   :  { %1573 = vsyncpa [#allocation12], 1 }

</bundles_post_ra>
